<compile_context>
chip_gen: v5e
topology: v5e:2x2
jax: 0.10.0
libtpu: 0.0.40
codegen_flags: <defaults>
</compile_context>

<pallas_src>
import functools
import math

import jax
import jax.numpy as jnp
from jax.experimental import pallas as pl
from jax.experimental.pallas import tpu as pltpu


def _gelu_erf(x):
    """Exact (erf-based) GELU matching torch.nn.GELU() (approximate='none').

    erf is evaluated with the Abramowitz & Stegun 7.1.26 rational approximation
    (|abs err| <= 1.5e-7), built only from exp + VPU arithmetic so it is
    guaranteed to lower on Mosaic.
    # TODO(synk): switch to lax.erf if a direct Mosaic erf lowering is available.
    """
    z = x * (1.0 / math.sqrt(2.0))
    az = jnp.abs(z)
    t = 1.0 / (1.0 + 0.3275911 * az)
    poly = t * (0.254829592 + t * (-0.284496736 + t * (1.421413741
               + t * (-1.453152027 + t * 1.061405429))))
    erf_abs = 1.0 - poly * jnp.exp(-az * az)
    erf = jnp.where(z >= 0.0, erf_abs, -erf_abs)
    return 0.5 * x * (1.0 + erf)


def _mlp_kernel(x_ref, w1_ref, b1_ref, w2_ref, b2_ref, o_ref, acc_ref, *,
                mxu_dtype):
    """Grid = (row_tiles, mlp_tiles).  The mlp axis is the fc2 reduction."""
    j = pl.program_id(1)

    @pl.when(j == 0)
    def _():
        acc_ref[...] = jnp.zeros_like(acc_ref)

    x = x_ref[...].astype(mxu_dtype)             # [tm, dim]
    w1 = w1_ref[...].astype(mxu_dtype)           # [dim, tk]  (pre-transposed)
    h = jnp.dot(x, w1, preferred_element_type=jnp.float32)    # [tm, tk] f32
    h = h + b1_ref[...].astype(jnp.float32)
    h = _gelu_erf(h)                             # f32 VPU math

    w2 = w2_ref[...].astype(mxu_dtype)           # [tk, dim]  (pre-transposed)
    acc_ref[...] += jnp.dot(h.astype(mxu_dtype), w2,
                            preferred_element_type=jnp.float32)

    @pl.when(j == pl.num_programs(1) - 1)
    def _():
        o_ref[...] = (acc_ref[...]
                      + b2_ref[...].astype(jnp.float32)).astype(o_ref.dtype)


def mlp_block(x, w1, b1, w2, b2, *, block_rows=64, block_mlp=256,
              mxu_dtype=None):
    """Fused MlpBlock forward.

    x : [..., dim]
    w1: [mlp_dim, dim] (PyTorch nn.Linear layout),  b1: [mlp_dim]
    w2: [dim, mlp_dim] (PyTorch nn.Linear layout),  b2: [dim]
    """
    orig_shape = x.shape
    dim = orig_shape[-1]
    mlp_dim = w1.shape[0]
    assert w1.shape == (mlp_dim, dim)
    assert w2.shape == (dim, mlp_dim)
    assert b1.shape == (mlp_dim,) and b2.shape == (dim,)

    x2d = x.reshape(-1, dim)
    n_rows = x2d.shape[0]

    tm = min(block_rows, n_rows)
    tk = min(block_mlp, mlp_dim)
    assert n_rows % tm == 0, (n_rows, tm)
    assert mlp_dim % tk == 0, (mlp_dim, tk)
    assert (tm % 8 == 0) or (tm == n_rows)
    assert (tk % 128 == 0) or (tk == mlp_dim)

    if mxu_dtype is None:
        mxu_dtype = x.dtype

    # Pre-transpose the weights ONCE, outside the kernel (no in-kernel XLU .T).
    w1_t = w1.T                      # [dim, mlp_dim]
    w2_t = w2.T                      # [mlp_dim, dim]
    b1_2d = b1.reshape(1, mlp_dim)
    b2_2d = b2.reshape(1, dim)

    grid = (n_rows // tm, mlp_dim // tk)

    flops = 4 * n_rows * dim * mlp_dim            # two matmuls (2 flops/MAC)
    transcendentals = n_rows * mlp_dim            # one exp per GELU element
    itemsize = jnp.dtype(x.dtype).itemsize
    bytes_accessed = itemsize * (2 * n_rows * dim         # x + out
                                 + 2 * dim * mlp_dim      # w1 + w2
                                 + mlp_dim + dim)         # biases

    kernel = functools.partial(_mlp_kernel, mxu_dtype=mxu_dtype)

    out2d = pl.pallas_call(
        kernel,
        out_shape=jax.ShapeDtypeStruct((n_rows, dim), x.dtype),
        grid_spec=pltpu.PrefetchScalarGridSpec(
            num_scalar_prefetch=0,
            grid=grid,
            in_specs=[
                pl.BlockSpec((tm, dim), lambda i, j: (i, 0)),   # x row tile
                pl.BlockSpec((dim, tk), lambda i, j: (0, j)),   # w1^T col tile
                pl.BlockSpec((1, tk), lambda i, j: (0, j)),     # b1 tile
                pl.BlockSpec((tk, dim), lambda i, j: (j, 0)),   # w2^T row tile
                pl.BlockSpec((1, dim), lambda i, j: (0, 0)),    # b2
            ],
            out_specs=pl.BlockSpec((tm, dim), lambda i, j: (i, 0)),
            scratch_shapes=[pltpu.VMEM((tm, dim), jnp.float32)],
        ),
        compiler_params=pltpu.CompilerParams(
            dimension_semantics=("parallel", "arbitrary")),
        cost_estimate=pl.CostEstimate(
            flops=flops,
            transcendentals=transcendentals,
            bytes_accessed=bytes_accessed),
    )(x2d, w1_t, b1_2d, w2_t, b2_2d)

    return out2d.reshape(orig_shape)


def reference(x, w1, b1, w2, b2):
    """Pure-JAX reproduction of MlpBlock.forward (exact-erf GELU)."""
    h = x @ w1.T + b1
    h = 0.5 * h * (1.0 + jax.lax.erf(h / math.sqrt(2.0)))
    return h @ w2.T + b2


if __name__ == "__main__":
    # Small shapes consistent with the module: batch=2, seq=64, dim=128,
    # mlp_dim = 4 * dim = 512.
    B, L, DIM = 2, 64, 128
    MLP_DIM = 4 * DIM

    key = jax.random.PRNGKey(0)
    kx, kw1, kb1, kw2, kb2 = jax.random.split(key, 5)

    x = jax.random.normal(kx, (B, L, DIM), dtype=jnp.float32)
    w1 = 0.02 * jax.random.normal(kw1, (MLP_DIM, DIM), dtype=jnp.float32)
    b1 = 0.01 * jax.random.normal(kb1, (MLP_DIM,), dtype=jnp.float32)
    w2 = 0.02 * jax.random.normal(kw2, (DIM, MLP_DIM), dtype=jnp.float32)
    b2 = 0.01 * jax.random.normal(kb2, (DIM,), dtype=jnp.float32)

    out = mlp_block(x, w1, b1, w2, b2)
    out = jax.block_until_ready(out)

    ref = reference(x, w1, b1, w2, b2)
    assert out.shape == (B, L, DIM)
    max_err = float(jnp.max(jnp.abs(out - ref)))
    assert jnp.allclose(out, ref, atol=2e-5, rtol=2e-5), max_err

    print("KERNEL_OK")
</pallas_src>

<mosaic_0001>
module attributes {stable_mosaic.version = 11 : i64} {
  func.func @_mlp_kernel(%arg0: i32, %arg1: i32, %arg2: memref<64x128xf32, #tpu.memory_space<vmem>>, %arg3: memref<128x256xf32, #tpu.memory_space<vmem>>, %arg4: memref<1x256xf32, #tpu.memory_space<vmem>>, %arg5: memref<256x128xf32, #tpu.memory_space<vmem>>, %arg6: memref<1x128xf32, #tpu.memory_space<vmem>>, %arg7: memref<64x128xf32, #tpu.memory_space<vmem>>, %arg8: memref<64x128xf32, #tpu.memory_space<vmem>>) attributes {dimension_semantics = [#tpu.dimension_semantics<parallel>, #tpu.dimension_semantics<arbitrary>], iteration_bounds = array<i64: 2, 2>, scalar_prefetch = 0 : i64, scratch_operands = 1 : i64, tpu.core_type = #tpu.core_type<tc>, window_params = [{transform_indices = @transform_0, window_bounds = array<i64: 64, 128>}, {transform_indices = @transform_1, window_bounds = array<i64: 128, 256>}, {transform_indices = @transform_2, window_bounds = array<i64: 1, 256>}, {transform_indices = @transform_3, window_bounds = array<i64: 256, 128>}, {pipeline_mode = #tpu.pipeline_mode<synchronous>, transform_indices = @transform_4, window_bounds = array<i64: 1, 128>}, {transform_indices = @transform_5, window_bounds = array<i64: 64, 128>}]} {
    %c0_i32 = arith.constant 0 : i32
    %0 = arith.cmpi eq, %arg1, %c0_i32 : i32
    %1 = arith.extui %0 : i1 to i32
    %c0_i32_0 = arith.constant 0 : i32
    %2 = arith.cmpi ne, %1, %c0_i32_0 : i32
    scf.if %2 {
      %cst_29 = arith.constant 0.000000e+00 : f32
      %57 = vector.broadcast %cst_29 : f32 to vector<64x128xf32>
      %c0_30 = arith.constant 0 : index
      %c0_31 = arith.constant 0 : index
      %58 = vector.load %arg8[%c0_30, %c0_31] : memref<64x128xf32, #tpu.memory_space<vmem>>, vector<64x128xf32>
      tpu.vector_store %arg8[%c0_30, %c0_31], %57 {strides = array<i32>} : memref<64x128xf32, #tpu.memory_space<vmem>>, vector<64x128xf32>,
    } else {
    }
    %c0 = arith.constant 0 : index
    %c0_1 = arith.constant 0 : index
    %3 = vector.load %arg2[%c0, %c0_1] : memref<64x128xf32, #tpu.memory_space<vmem>>, vector<64x128xf32>
    %c0_2 = arith.constant 0 : index
    %c0_3 = arith.constant 0 : index
    %4 = vector.load %arg3[%c0_2, %c0_3] : memref<128x256xf32, #tpu.memory_space<vmem>>, vector<128x256xf32>
    %cst = arith.constant dense<0.000000e+00> : vector<64x256xf32>
    %5 = tpu.matmul %3, %4, %cst {dimension_numbers = #tpu.dot_dimension_numbers<[1], [0], [0], [1], [0, 0, 1, 1], [], []>} : vector<64x128xf32>, vector<128x256xf32>, vector<64x256xf32> -> vector<64x256xf32>
    %c0_4 = arith.constant 0 : index
    %c0_5 = arith.constant 0 : index
    %6 = vector.load %arg4[%c0_4, %c0_5] : memref<1x256xf32, #tpu.memory_space<vmem>>, vector<1x256xf32>
    %7 = vector.broadcast %6 : vector<1x256xf32> to vector<64x256xf32>
    %8 = arith.addf %5, %7 : vector<64x256xf32>
    %cst_6 = arith.constant 0.707106769 : f32
    %9 = vector.broadcast %cst_6 : f32 to vector<64x256xf32>
    %10 = arith.mulf %8, %9 : vector<64x256xf32>
    %11 = math.absf %10 : vector<64x256xf32>
    %cst_7 = arith.constant 0.327591091 : f32
    %12 = vector.broadcast %cst_7 : f32 to vector<64x256xf32>
    %13 = arith.mulf %12, %11 : vector<64x256xf32>
    %cst_8 = arith.constant 1.000000e+00 : f32
    %14 = vector.broadcast %cst_8 : f32 to vector<64x256xf32>
    %15 = arith.addf %14, %13 : vector<64x256xf32>
    %cst_9 = arith.constant 1.000000e+00 : f32
    %16 = vector.broadcast %cst_9 : f32 to vector<64x256xf32>
    %17 = arith.divf %16, %15 : vector<64x256xf32>
    %cst_10 = arith.constant 1.06140542 : f32
    %18 = vector.broadcast %cst_10 : f32 to vector<64x256xf32>
    %19 = arith.mulf %17, %18 : vector<64x256xf32>
    %cst_11 = arith.constant -1.45315206 : f32
    %20 = vector.broadcast %cst_11 : f32 to vector<64x256xf32>
    %21 = arith.addf %20, %19 : vector<64x256xf32>
    %22 = arith.mulf %17, %21 : vector<64x256xf32>
    %cst_12 = arith.constant 1.42141378 : f32
    %23 = vector.broadcast %cst_12 : f32 to vector<64x256xf32>
    %24 = arith.addf %23, %22 : vector<64x256xf32>
    %25 = arith.mulf %17, %24 : vector<64x256xf32>
    %cst_13 = arith.constant -0.284496725 : f32
    %26 = vector.broadcast %cst_13 : f32 to vector<64x256xf32>
    %27 = arith.addf %26, %25 : vector<64x256xf32>
    %28 = arith.mulf %17, %27 : vector<64x256xf32>
    %cst_14 = arith.constant 0.254829586 : f32
    %29 = vector.broadcast %cst_14 : f32 to vector<64x256xf32>
    %30 = arith.addf %29, %28 : vector<64x256xf32>
    %31 = arith.mulf %17, %30 : vector<64x256xf32>
    %cst_15 = arith.constant 0.000000e+00 : f32
    %32 = vector.broadcast %cst_15 : f32 to vector<64x256xf32>
    %33 = arith.subf %32, %11 : vector<64x256xf32>
    %34 = arith.mulf %33, %11 : vector<64x256xf32>
    %35 = math.exp %34 : vector<64x256xf32>
    %36 = arith.mulf %31, %35 : vector<64x256xf32>
    %cst_16 = arith.constant 1.000000e+00 : f32
    %37 = vector.broadcast %cst_16 : f32 to vector<64x256xf32>
    %38 = arith.subf %37, %36 : vector<64x256xf32>
    %cst_17 = arith.constant 0.000000e+00 : f32
    %39 = vector.broadcast %cst_17 : f32 to vector<64x256xf32>
    %40 = arith.cmpf oge, %10, %39 : vector<64x256xf32>
    %cst_18 = arith.constant 0.000000e+00 : f32
    %41 = vector.broadcast %cst_18 : f32 to vector<64x256xf32>
    %42 = arith.subf %41, %38 : vector<64x256xf32>
    %43 = arith.select %40, %38, %42 : vector<64x256xi1>, vector<64x256xf32>
    %cst_19 = arith.constant 5.000000e-01 : f32
    %44 = vector.broadcast %cst_19 : f32 to vector<64x256xf32>
    %45 = arith.mulf %44, %8 : vector<64x256xf32>
    %cst_20 = arith.constant 1.000000e+00 : f32
    %46 = vector.broadcast %cst_20 : f32 to vector<64x256xf32>
    %47 = arith.addf %46, %43 : vector<64x256xf32>
    %48 = arith.mulf %45, %47 : vector<64x256xf32>
    %c0_21 = arith.constant 0 : index
    %c0_22 = arith.constant 0 : index
    %49 = vector.load %arg5[%c0_21, %c0_22] : memref<256x128xf32, #tpu.memory_space<vmem>>, vector<256x128xf32>
    %c0_23 = arith.constant 0 : index
    %c0_24 = arith.constant 0 : index
    %50 = vector.load %arg8[%c0_23, %c0_24] : memref<64x128xf32, #tpu.memory_space<vmem>>, vector<64x128xf32>
    %cst_25 = arith.constant dense<0.000000e+00> : vector<64x128xf32>
    %51 = tpu.matmul %48, %49, %cst_25 {dimension_numbers = #tpu.dot_dimension_numbers<[1], [0], [0], [1], [0, 0, 1, 1], [], []>} : vector<64x256xf32>, vector<256x128xf32>, vector<64x128xf32> -> vector<64x128xf32>
    %52 = arith.addf %50, %51 : vector<64x128xf32>
    %c0_26 = arith.constant 0 : index
    %c0_27 = arith.constant 0 : index
    %53 = vector.load %arg8[%c0_26, %c0_27] : memref<64x128xf32, #tpu.memory_space<vmem>>, vector<64x128xf32>
    tpu.vector_store %arg8[%c0_26, %c0_27], %52 {strides = array<i32>} : memref<64x128xf32, #tpu.memory_space<vmem>>, vector<64x128xf32>,
    %c1_i32 = arith.constant 1 : i32
    %54 = arith.cmpi eq, %arg1, %c1_i32 : i32
    %55 = arith.extui %54 : i1 to i32
    %c0_i32_28 = arith.constant 0 : i32
    %56 = arith.cmpi ne, %55, %c0_i32_28 : i32
    scf.if %56 {
      %c0_29 = arith.constant 0 : index
      %c0_30 = arith.constant 0 : index
      %57 = vector.load %arg8[%c0_29, %c0_30] : memref<64x128xf32, #tpu.memory_space<vmem>>, vector<64x128xf32>
      %c0_31 = arith.constant 0 : index
      %c0_32 = arith.constant 0 : index
      %58 = vector.load %arg6[%c0_31, %c0_32] : memref<1x128xf32, #tpu.memory_space<vmem>>, vector<1x128xf32>
      %59 = vector.broadcast %58 : vector<1x128xf32> to vector<64x128xf32>
      %60 = arith.addf %57, %59 : vector<64x128xf32>
      %c0_33 = arith.constant 0 : index
      %c0_34 = arith.constant 0 : index
      %61 = vector.load %arg7[%c0_33, %c0_34] : memref<64x128xf32, #tpu.memory_space<vmem>>, vector<64x128xf32>
      tpu.vector_store %arg7[%c0_33, %c0_34], %60 {strides = array<i32>} : memref<64x128xf32, #tpu.memory_space<vmem>>, vector<64x128xf32>,
    } else {
    }
    return
  }
  func.func @transform_0(%arg0: i32, %arg1: i32) -> (i32, i32) {
    %c0_i32 = arith.constant 0 : i32
    %c0_i32_0 = arith.constant 0 : i32
    return %arg0, %c0_i32 : i32, i32
  }
  func.func @transform_1(%arg0: i32, %arg1: i32) -> (i32, i32) {
    %c0_i32 = arith.constant 0 : i32
    %c0_i32_0 = arith.constant 0 : i32
    return %c0_i32, %arg1 : i32, i32
  }
  func.func @transform_2(%arg0: i32, %arg1: i32) -> (i32, i32) {
    %c0_i32 = arith.constant 0 : i32
    %c0_i32_0 = arith.constant 0 : i32
    return %c0_i32, %arg1 : i32, i32
  }
  func.func @transform_3(%arg0: i32, %arg1: i32) -> (i32, i32) {
    %c0_i32 = arith.constant 0 : i32
    %c0_i32_0 = arith.constant 0 : i32
    return %arg1, %c0_i32 : i32, i32
  }
  func.func @transform_4(%arg0: i32, %arg1: i32) -> (i32, i32) {
    %c0_i32 = arith.constant 0 : i32
    %c0_i32_0 = arith.constant 0 : i32
    %c0_i32_1 = arith.constant 0 : i32
    return %c0_i32, %c0_i32_0 : i32, i32
  }
  func.func @transform_5(%arg0: i32, %arg1: i32) -> (i32, i32) {
    %c0_i32 = arith.constant 0 : i32
    %c0_i32_0 = arith.constant 0 : i32
    return %arg0, %c0_i32 : i32, i32
  }
}

</mosaic_0001>

<bundles_post_ra>
// kernel: tpu_custom_call.1
= control target key start
LH: loop header
LB: loop body
LE: loop exit
PB: predicated region body
PF: predicated region fallthrough
CT: control target
= control target key end

     0   :  { %s3201_s0 = inlined_call_operand.hbm [shape: f32[128,128], index: 0, kind: input, shape index: {}]   ;;  %s3202_s1 = inlined_call_operand.hbm [shape: f32[128,512], index: 1, kind: input, shape index: {}]   ;;  %s3203_s2 = inlined_call_operand.hbm [shape: f32[1,512], index: 2, kind: input, shape index: {}]   ;;  %s3204_s3 = inlined_call_operand.hbm [shape: f32[512,128], index: 3, kind: input, shape index: {}]   ;;  %s3205_s4 = inlined_call_operand.vmem [shape: f32[1,128], index: 4, kind: input, shape index: {}]   ;;  %s3206_s5 = inlined_call_operand.hbm [shape: f32[128,128], index: 5, kind: output, shape index: {}]  }
   0x1   :  { %3251 = sst [smem:[#allocation67_spill]] %s3201_s0 }
   0x2   :  { %3252 = sst [smem:[#allocation68_spill]] %s3202_s1 }
   0x3   :  { %3253 = sst [smem:[#allocation69_spill]] %s3205_s4 }
   0x4   :  { %3254 = sst [smem:[#allocation70_spill]] %s3206_s5 }
   0x5   :  { %10 = vsyncpa [#allocation4], 0 }
   0x6   :  { %12 = vsyncpa [#allocation4 + $0x1], 0 }
   0x7   :  { %13 = vsyncpa [#allocation7], 0 }
   0x8   :  { %15 = vsyncpa [#allocation7 + $0x1], 0 }
   0x9   :  { %16 = vsyncpa [#allocation10], 0 }
   0xa   :  { %18 = vsyncpa [#allocation10 + $0x1], 0 }
   0xb   :  { %19 = vsyncpa [#allocation5], 0 }
   0xc   :  { %21 = vsyncpa [#allocation5 + $0x1], 0  ;;  %s2010_s18 = smov 0   ;;  %s2012_s19 = smov 0  }
   0xd   :  { %s2014_s20 = smov 0   ;;  %s2016_s21 = smov 0  }
   0xe   :  { %s2018_s22 = smov 0   ;;  %s2020_s23 = smov 0  }
   0xf   :  { %s2022_s24 = smov 0   ;;  %s2024_s25 = smov 0  }
  0x10   :  { %s2026_s26 = smov 0   ;;  %s2028_s27 = smov 0  }
  0x11   :  { %s2030_s28 = smov 0  }
  0x12 LB: > { %3255 = sst [smem:[#allocation16_spill]] %s1938_s20  ;;  %p54_p0 = scmp.eq.s32.totalorder %s1970_s28, 0  ;;  %s1970_s28 = sphi %s2030_s28, %s27_s28   ;;  %s1966_s27 = sphi %s2028_s27, %s3414_s27   ;;  %s1962_s26 = sphi %s2026_s26, %s3420_s26   ;;  %s1958_s25 = sphi %s2024_s25, %s3412_s25   ;;  %s1954_s24 = sphi %s2022_s24, %s3419_s24   ;;  %s1950_s23 = sphi %s2020_s23, %s3411_s23   ;;  %s1946_s22 = sphi %s2018_s22, %s3418_s22   ;;  %s1942_s21 = sphi %s2016_s21, %s3417_s21   ;;  %s1938_s20 = sphi %s2014_s20, %s3409_s20   ;;  %s1934_s19 = sphi %s2012_s19, %s3416_s19   ;;  %s1930_s18 = sphi %s2010_s18, %s3415_s18  }
  0x13   : > { %3256 = sst [smem:[#allocation17_spill]] %s1942_s21  ;;  %s72_s29 = sadd.s32 1, %s1938_s20 }
  0x14   : > { %3257 = sst [smem:[#allocation18_spill]] %s1950_s23  ;;  %p79_p1 = scmp.ne.s32.totalorder %s1938_s20, %s1934_s19 }
  0x15   : > { %3258 = sst [smem:[#allocation19_spill]] %s1958_s25  ;;  %p85_p2 = scmp.ne.s32.totalorder %s1934_s19, %s1930_s18 }
  0x16   : > { %3259 = sst [smem:[#allocation20_spill]] %s1966_s27  ;;  %p3209_p3 = scmp.lt.s32.totalorder %s1970_s28, 4 }
  0x17   : > { %3260 = sst [smem:[#allocation21_spill]] %s1970_s28  ;;  %p81_p4 = por %p79_p1, %p54_p0 }
  0x18   : > { %s233_s30 = sand.u32 1, %s1970_s28   ;;  %s2076_s6 = sand.u32 1, %s1938_s20  }
  0x19   : > { %s3207_s7 = sshll.u32 %s2076_s6, 8  ;;  %s1527_s8 = sshll.u32 %s1962_s26, 4 }
  0x1a   : > { %s3261_s1 = sld [smem:[#allocation68_spill]]  ;;  %s237_s13 = scalar_lea.vmem [#allocation6], %s3207_s7 }
  0x1b   : > { %s245_s14 = sshll.u32 %s237_s13, 4  ;;  %p2087_p5 = pnand %p3209_p3, %p81_p4  ;;  %s246_s14 = int_to_ptr.vmem [resolvable:$true] %s245_s14 }
  0x1c   : > { %p1513_p6 = scmp.ge.s32.totalorder %s1970_s28, 1  ;;  %s2092_s16 = scalar_lea.sflag [#allocation7], %s233_s30 }
  0x1d   : > { %s1972_s17 = smov 512   ;;  %s1974_s9 = smov 16  }
  0x1e   : > { %p294_p7 = scmp.lt.s32.totalorder %s1970_s28, 5  ;;  %s2103_s30 = sadd.s32 4294967295, %s1970_s28  }
  0x1f   : > { %s36_s13 = sadd.s32 1, %s1962_s26  ;;  %s39_s7 = sadd.s32 1, %s1966_s27 }
  0x20   : > { %s242_s11 = scalar_lea.hbm %s3261_s1, %s1527_s8  ;;  %s1973_s8 = smov 256  }
  0x21   : > { %s243_s12 = sshll.u32 %s242_s11, 4  ;;  %p2098_p8 = pnand %p1513_p6, %p294_p7  ;;  %s244_s12 = int_to_ptr.hbm [resolvable:$true] %s243_s12 }
  0x22   : > { %1546 = dma.hbm_to_vmem [thread:$0]  (!%p2087_p5), %s244_s12, 4096, %s246_s14, %s2092_s16, %s1972_s17, %s1973_s8, %s1974_s9  }
  0x23   : > { %s1499_s11 = sadd.s32 4294967294, %s1970_s28   ;;  %p37_p9 = scmp.ge.s32.totalorder %s36_s13, 2 }
  0x24   : > { %s46_s12 = sadd.s32 1, %s1950_s23  ;;  %p53_p10 = scmp.ne.s32.totalorder %s1950_s23, %s1946_s22 }
  0x25   : > { %p59_p11 = scmp.ne.s32.totalorder %s1946_s22, %s1942_s21  ;;  %s3422_s13 = smov (%p37_p9, %s36_s13), 0 }
  0x26   : > { %3264 = sst [smem:[#allocation22_spill]] %s3422_s13  ;;  %s3424_s7 = smov (!%p37_p9, %s39_s7), %s1966_s27 }
  0x27   : > { %p2121_p12 = por %p54_p0, %p53_p10  ;;  %p60_p13 = scmp.eq.s32.totalorder %s2103_s30, 0 }
  0x28   : > { %p41_p1 = scmp.ge.s32.totalorder %s3424_s7, 2  ;;  %s69_s17 = ssub.s32 %s1962_s26, %s3422_s13 }
  0x29   : > { %p2131_p4 = por %p60_p13, %p59_p11  ;;  %p70_p6 = scmp.eq.s32.totalorder %s69_s17, 0 }
  0x2a   : > { %s3426_s7 = smov (%p41_p1, %s3424_s7), 0  ;;  %p2147_p0 = por %p85_p2, %p60_p13 }
  0x2b   : > { %3267 = sst [smem:[#allocation23_spill]] %s3426_s7  ;;  %s43_s1 = ssub.s32 %s1966_s27, %s3426_s7 }
  0x2c   : > { %s2140_s9 = scalar_select %p70_p6, %s1938_s20, %s72_s29  }
  0x2d   : > { %p44_p7 = scmp.eq.s32.totalorder %s43_s1, 0  ;;  %p182_p9 = scmp.eq.s32.totalorder %s2103_s30, 3 }
  0x2e   : > { %3268 = sst [smem:[#allocation24_spill]] %s2140_s9  ;;  %p188_p3 = scmp.eq.s32.totalorder %s1499_s11, 3 }
  0x2f   : > { %s211_s13 = sand.u32 1, %s1950_s23   ;;  %p2159_p1 = por %p182_p9, %p53_p10 }
  0x30   : > { %s2154_s17 = scalar_select %p44_p7, %s1950_s23, %s46_s12  }
  0x31   : > { %s3271_s25 = scalar_select %p2159_p1, 1, 0 }
  0x32   : > { %3270 = sst [smem:[#allocation25_spill]] %s2154_s17  ;;  %p2166_p2 = por %p188_p3, %p59_p11 }
  0x33   : > { %3272 = sst [smem:[#allocation26_spill]] %s3271_s25  ;;  %s1502_s29 = sshll.u32 %s211_s13, 6 }
  0x34   : > { %s3273_s18 = scalar_select %p2166_p2, 1, 0 }
  0x35   : > { %s1526_s7 = sshll.u32 %s1966_s27, 6  ;;  %s3275_s0 = sld [smem:[#allocation67_spill]] }
  0x36   : > { %3274 = sst [smem:[#allocation27_spill]] %s3273_s18  ;;  %s215_s20 = scalar_lea.vmem [#allocation3], %s1502_s29 }
  0x37   : > { %s223_s12 = sshll.u32 %s215_s20, 4  ;;  %p3276_p10 = scmp.lt.s32.totalorder %s1970_s28, 4  ;;  %s224_s12 = int_to_ptr.vmem [resolvable:$true] %s223_s12 }
  0x38   : > { %s1508_s23 = sshll.u32 %s2076_s6, 1  ;;  %s212_s18 = scalar_lea.sflag [#allocation4], %s211_s13 }
  0x39   : > { %p1541_p3 = pnand %p3276_p10, %p2121_p12  ;;  %s1975_s21 = smov 128  }
  0x3a   : > { %s1976_s27 = smov 8   ;;  %s1509_s9 = sshll.u32 %s1962_s26, 1 }
  0x3b   : > { %s220_s11 = scalar_lea.hbm %s3275_s0, %s1526_s7  ;;  %s263_s20 = scalar_lea.hbm %s3203_s2, %s1509_s9 }
  0x3c   : > { %s221_s17 = sshll.u32 %s220_s11, 4  ;;  %s259_s1 = scalar_lea.vmem [#allocation8], %s1508_s23  ;;  %s222_s17 = int_to_ptr.hbm [resolvable:$true] %s221_s17 }
  0x3d   : > { %1543 = dma.hbm_to_vmem [thread:$0]  (!%p1541_p3), %s222_s17, 1024, %s224_s12, %s212_s18, %s1975_s21, %s1975_s21, %s1976_s27  }
  0x3e   : > { %s267_s11 = sshll.u32 %s259_s1, 4  ;;  %s265_s0 = sshll.u32 %s263_s20, 4  ;;  %s268_s11 = int_to_ptr.vmem [resolvable:$true] %s267_s11  ;;  %s266_s0 = int_to_ptr.hbm [resolvable:$true] %s265_s0 }
  0x3f   : > { %1549 = dma.hbm_to_vmem [thread:$0]  (!%p2087_p5), %s266_s0, 32, %s268_s11, %s2092_s16  }
  0x40   : > { %s1528_s14 = sshll.u32 %s1962_s26, 8  ;;  %s3277_s17 = sshll.u32 %s2076_s6, 8 }
  0x41   : > { %s283_s25 = scalar_lea.hbm %s3204_s3, %s1528_s14  ;;  %s278_s18 = scalar_lea.vmem [#allocation9], %s3277_s17 }
  0x42   : > { %s286_s12 = sshll.u32 %s278_s18, 4  ;;  %s284_s4 = sshll.u32 %s283_s25, 4  ;;  %s287_s12 = int_to_ptr.vmem [resolvable:$true] %s286_s12  ;;  %s285_s4 = int_to_ptr.hbm [resolvable:$true] %s284_s4 }
  0x43   : > { %s275_s7 = scalar_lea.sflag [#allocation10], %s2076_s6  ;;  %298 = sbr.rel (%p2098_p8) target bundleno = 607 (0x25f), region = 40 }
  0x44   : > { %1552 = dma.hbm_to_vmem [thread:$0]  (!%p2087_p5), %s285_s4, 4096, %s287_s12, %s275_s7, %s1975_s21, %s1975_s21, %s1976_s27  }
  0x48   : > { %s2198_s0 = sand.u32 1, %s1946_s22  }
  0x49   : > { %s1514_s23 = sshll.u32 %s2198_s0, 6  ;;  %s301_s28 = scalar_lea.sflag [#allocation4], %s2198_s0 }
  0x4a   : > { %s2202_s16 = scalar_lea.vmem [#allocation3], %s1514_s23 }
  0x4b   : > { %1913 = dma.done.wait (%p2131_p4), %s301_s28, 1024  }
  0x4c   : > { %1915 = vsyncadd (%p2131_p4), %s301_s28, 4294966272  ;;  %s310_s4 = sand.u32 1, %s2103_s30   ;;  %s312_s21 = sand.u32 1, %s1934_s19  }
  0x4d   : > { %s1515_s25 = sshll.u32 %s312_s21, 8  ;;  %s311_s27 = scalar_lea.sflag [#allocation7], %s310_s4 }
  0x4e   : > { %s2210_s6 = scalar_lea.vmem [#allocation6], %s1515_s25 }
  0x4f   : > { %1917 = dma.done.wait (%p2147_p0), %s311_s27, 4128  }
  0x50   : > { %1919 = vsyncadd (%p2147_p0), %s311_s27, 4294963168  ;;  %s1516_s15 = sshll.u32 %s312_s21, 1  ;;  %s331_s8 = scalar_lea.sflag [#allocation10], %s312_s21 }
  0x51   : > { %s2216_s10 = scalar_lea.vmem [#allocation8], %s1516_s15  ;;  %s2218_s9 = scalar_lea.vmem [#allocation9], %s1515_s25 }
  0x52   : > { %1921 = dma.done.wait (%p2147_p0), %s331_s8, 4096  }
  0x53   : > { %1923 = vsyncadd (%p2147_p0), %s331_s8, 4294963200  ;;  %s2224_s30 = scalar_lea.vmem [#allocation11], %s1514_s23  ;;  %p1519_p5 = scmp.ne.s32.totalorder %s1954_s24, 0 }
  0x55   : > { %385 = sbr.rel (%p1519_p5) target bundleno = 99 (0x63), region = 60 }
  0x5a   : > { %v1977_v0 = vmov 0.0  }
  0x5b   : > { %386 = vst [vmem:[#allocation2 + $0x30] sm:$0xff] %v1977_v0 }
  0x5c   : > { %387 = vst [vmem:[#allocation2] sm:$0xff] %v1977_v0 }
  0x5d   : > { %388 = vst [vmem:[#allocation2 + $0x18] sm:$0xff] %v1977_v0 }
  0x5e   : > { %389 = vst [vmem:[#allocation2 + $0x10] sm:$0xff] %v1977_v0 }
  0x5f   : > { %390 = vst [vmem:[#allocation2 + $0x8] sm:$0xff] %v1977_v0 }
  0x60   : > { %391 = vst [vmem:[#allocation2 + $0x20] sm:$0xff] %v1977_v0 }
  0x61   : > { %392 = vst [vmem:[#allocation2 + $0x28] sm:$0xff] %v1977_v0 }
  0x62   : > { %393 = vst [vmem:[#allocation2 + $0x38] sm:$0xff] %v1977_v0 }
  0x63 PF: > { %v432_v1 = vld [vmem:[%s2210_s6 + $0xf0] sm:$0xff]  ;;  %v433_v2 = vld [vmem:[%s2210_s6 + $0xf8] sm:$0xff]  ;;  %v430_v3 = vld [vmem:[%s2210_s6 + $0xe0] sm:$0xff]  ;;  %p1520_p8 = scmp.ne.s32.totalorder %s1954_s24, 1 }
  0x64   : > { %440 = vmatpush.msra.mxu0 %v432_v1  ;;  %481 = vmatpush.msra.mxu1 %v433_v2  ;;  %v431_v4 = vld [vmem:[%s2210_s6 + $0xe8] sm:$0xff]  ;;  %v428_v5 = vld [vmem:[%s2210_s6 + $0xd0] sm:$0xff]  ;;  %v429_v6 = vld [vmem:[%s2210_s6 + $0xd8] sm:$0xff]  ;;  %s3401_s20 = sld [smem:[#allocation69_spill]] (!%p1520_p8) }
  0x65   : > { %v426_v7 = vld [vmem:[%s2210_s6 + $0xc0] sm:$0xff]  ;;  %v427_v8 = vld [vmem:[%s2210_s6 + $0xc8] sm:$0xff]  ;;  %v424_v9 = vld [vmem:[%s2210_s6 + $0xb0] sm:$0xff] }
  0x66   : > { %441 = vmatpush.msra.mxu0 %v430_v3  ;;  %482 = vmatpush.msra.mxu1 %v431_v4  ;;  %v425_v10 = vld [vmem:[%s2210_s6 + $0xb8] sm:$0xff]  ;;  %v422_v11 = vld [vmem:[%s2210_s6 + $0xa0] sm:$0xff]  ;;  %v423_v12 = vld [vmem:[%s2210_s6 + $0xa8] sm:$0xff] }
  0x67   : > { %v420_v13 = vld [vmem:[%s2210_s6 + $0x90] sm:$0xff]  ;;  %v421_v14 = vld [vmem:[%s2210_s6 + $0x98] sm:$0xff]  ;;  %v418_v15 = vld [vmem:[%s2210_s6 + $0x80] sm:$0xff] }
  0x68   : > { %442 = vmatpush.msra.mxu0 %v428_v5  ;;  %483 = vmatpush.msra.mxu1 %v429_v6  ;;  %v419_v16 = vld [vmem:[%s2210_s6 + $0x88] sm:$0xff]  ;;  %v416_v17 = vld [vmem:[%s2210_s6 + $0x70] sm:$0xff]  ;;  %v417_v18 = vld [vmem:[%s2210_s6 + $0x78] sm:$0xff] }
  0x69   : > { %v414_v19 = vld [vmem:[%s2210_s6 + $0x60] sm:$0xff]  ;;  %v415_v20 = vld [vmem:[%s2210_s6 + $0x68] sm:$0xff]  ;;  %v412_v21 = vld [vmem:[%s2210_s6 + $0x50] sm:$0xff] }
  0x6a   : > { %443 = vmatpush.msra.mxu0 %v426_v7  ;;  %484 = vmatpush.msra.mxu1 %v427_v8  ;;  %v413_v22 = vld [vmem:[%s2210_s6 + $0x58] sm:$0xff]  ;;  %v410_v23 = vld [vmem:[%s2210_s6 + $0x40] sm:$0xff]  ;;  %v411_v24 = vld [vmem:[%s2210_s6 + $0x48] sm:$0xff] }
  0x6b   : > { %v408_v25 = vld [vmem:[%s2210_s6 + $0x30] sm:$0xff]  ;;  %v409_v26 = vld [vmem:[%s2210_s6 + $0x38] sm:$0xff]  ;;  %v406_v27 = vld [vmem:[%s2210_s6 + $0x20] sm:$0xff] }
  0x6c   : > { %444 = vmatpush.msra.mxu0 %v424_v9  ;;  %485 = vmatpush.msra.mxu1 %v425_v10  ;;  %v407_v28 = vld [vmem:[%s2210_s6 + $0x28] sm:$0xff]  ;;  %v404_v29 = vld [vmem:[%s2210_s6 + $0x10] sm:$0xff]  ;;  %v405_v30 = vld [vmem:[%s2210_s6 + $0x18] sm:$0xff] }
  0x6d   : > { %v402_v31 = vld [vmem:[%s2210_s6] sm:$0xff]  ;;  %v403_v32 = vld [vmem:[%s2210_s6 + $0x8] sm:$0xff]  ;;  %v396_v35 = vld [vmem:[%s2202_s16 + $0x10] sm:$0xff] }
  0x6e   : > { %445 = vmatpush.msra.mxu0 %v422_v11  ;;  %486 = vmatpush.msra.mxu1 %v423_v12  ;;  %v394_v33 = vld [vmem:[%s2202_s16] sm:$0xff]  ;;  %v395_v34 = vld [vmem:[%s2202_s16 + $0x8] sm:$0xff]  ;;  %v397_v36 = vld [vmem:[%s2202_s16 + $0x18] sm:$0xff] }
  0x6f   : > { %v398_v37 = vld [vmem:[%s2202_s16 + $0x20] sm:$0xff]  ;;  %v399_v38 = vld [vmem:[%s2202_s16 + $0x28] sm:$0xff]  ;;  %v400_v39 = vld [vmem:[%s2202_s16 + $0x30] sm:$0xff] }
  0x70   : > { %446 = vmatpush.msra.mxu0 %v420_v13  ;;  %487 = vmatpush.msra.mxu1 %v421_v14  ;;  %v401_v40 = vld [vmem:[%s2202_s16 + $0x38] sm:$0xff]  ;;  %v434_v41 = vld [vmem:[%s2216_s10] sm:$0x3]  ;;  %v1175_v53 = vld [vmem:[%s2218_s9 + $0x68] sm:$0xff] }
  0x71   : > { %v2268_v42 = vperm.slane %v434_v41, 0  ;;  %v2270_v43 = vperm.slane %v434_v41, 1  ;;  %v1177_v44 = vld [vmem:[%s2218_s9 + $0x78] sm:$0xff]  ;;  %v1176_v50 = vld [vmem:[%s2218_s9 + $0x70] sm:$0xff]  ;;  %v1191_v54 = vld [vmem:[%s2218_s9 + $0xe8] sm:$0xff] }
  0x72   : > { %447 = vmatpush.msra.mxu0 %v418_v15  ;;  %488 = vmatpush.msra.mxu1 %v419_v16  ;;  %v1193_v45 = vld [vmem:[%s2218_s9 + $0xf8] sm:$0xff]  ;;  %v1192_v51 = vld [vmem:[%s2218_s9 + $0xf0] sm:$0xff]  ;;  %v1174_v57 = vld [vmem:[%s2218_s9 + $0x60] sm:$0xff] }
  0x73   : > { %1202 = vmatpush.msra.mxu2 %v1177_v44  ;;  %1243 = vmatpush.msra.mxu3 %v1193_v45  ;;  %v1190_v58 = vld [vmem:[%s2218_s9 + $0xe0] sm:$0xff]  ;;  %v1173_v61 = vld [vmem:[%s2218_s9 + $0x58] sm:$0xff]  ;;  %v1172_v3 = vld [vmem:[%s2218_s9 + $0x50] sm:$0xff] }
  0x74   : > { %448 = vmatpush.msra.mxu0 %v416_v17  ;;  %489 = vmatpush.msra.mxu1 %v417_v18  ;;  %v1189_v62 = vld [vmem:[%s2218_s9 + $0xd8] sm:$0xff]  ;;  %v1188_v4 = vld [vmem:[%s2218_s9 + $0xd0] sm:$0xff]  ;;  %v1171_v6 = vld [vmem:[%s2218_s9 + $0x48] sm:$0xff] }
  0x75   : > { %1203 = vmatpush.msra.mxu2 %v1176_v50  ;;  %1244 = vmatpush.msra.mxu3 %v1192_v51  ;;  %v1187_v10 = vld [vmem:[%s2218_s9 + $0xc8] sm:$0xff]  ;;  %v1170_v12 = vld [vmem:[%s2218_s9 + $0x40] sm:$0xff]  ;;  %v1169_v17 = vld [vmem:[%s2218_s9 + $0x38] sm:$0xff] }
  0x76   : > { %449 = vmatpush.msra.mxu0 %v414_v19  ;;  %490 = vmatpush.msra.mxu1 %v415_v20  ;;  %v1186_v13 = vld [vmem:[%s2218_s9 + $0xc0] sm:$0xff]  ;;  %v1185_v18 = vld [vmem:[%s2218_s9 + $0xb8] sm:$0xff] }
  0x77   : > { %1204 = vmatpush.msra.mxu2 %v1175_v53  ;;  %1245 = vmatpush.msra.mxu3 %v1191_v54  ;;  %v1165_v41 = vld [vmem:[%s2218_s9 + $0x18] sm:$0xff]  ;;  %v1164_v54 = vld [vmem:[%s2218_s9 + $0x10] sm:$0xff] }
  0x78   : > { %450 = vmatpush.msra.mxu0 %v412_v21  ;;  %491 = vmatpush.msra.mxu1 %v413_v22  ;;  %v1168_v22 = vld [vmem:[%s2218_s9 + $0x30] sm:$0xff]  ;;  %v1181_v44 = vld [vmem:[%s2218_s9 + $0x98] sm:$0xff] }
  0x79   : > { %1205 = vmatpush.msra.mxu2 %v1174_v57  ;;  %1246 = vmatpush.msra.mxu3 %v1190_v58 }
  0x7a   : > { %451 = vmatpush.msra.mxu0 %v410_v23  ;;  %492 = vmatpush.msra.mxu1 %v411_v24  ;;  %v1184_v23 = vld [vmem:[%s2218_s9 + $0xb0] sm:$0xff] }
  0x7b   : > { %1206 = vmatpush.msra.mxu2 %v1173_v61  ;;  %1247 = vmatpush.msra.mxu3 %v1189_v62  ;;  %v1163_v62 = vld [vmem:[%s2218_s9 + $0x8] sm:$0xff] }
  0x7c   : > { %452 = vmatpush.msra.mxu0 %v408_v25  ;;  %493 = vmatpush.msra.mxu1 %v409_v26 }
  0x7d   : > { %1207 = vmatpush.msra.mxu2 %v1172_v3  ;;  %1248 = vmatpush.msra.mxu3 %v1188_v4 }
  0x7e   : > { %453 = vmatpush.msra.mxu0 %v406_v27  ;;  %494 = vmatpush.msra.mxu1 %v407_v28  ;;  %v1167_v28 = vld [vmem:[%s2218_s9 + $0x28] sm:$0xff] }
  0x7f   : > { %1208 = vmatpush.msra.mxu2 %v1171_v6  ;;  %1249 = vmatpush.msra.mxu3 %v1187_v10 }
  0x80   : > { %454 = vmatpush.msra.mxu0 %v404_v29  ;;  %495 = vmatpush.msra.mxu1 %v405_v30  ;;  %v1183_v29 = vld [vmem:[%s2218_s9 + $0xa8] sm:$0xff] }
  0x81   : > { %1209 = vmatpush.msra.mxu2 %v1170_v12  ;;  %1250 = vmatpush.msra.mxu3 %v1186_v13 }
  0x82   : > { %455 = vmatpush.msra.mxu0 %v402_v31  ;;  %496 = vmatpush.msra.mxu1 %v403_v32  ;;  %v1166_v32 = vld [vmem:[%s2218_s9 + $0x20] sm:$0xff] }
  0x83   : > { %456 = vmatmul.f32.vlgmr.msra.gmra.mxu0 %v394_v33  ;;  %497 = vmatmul.f32.vlgmr.msra.gmra.mxu1 %v394_v33  ;;  %v1182_v33 = vld [vmem:[%s2218_s9 + $0xa0] sm:$0xff] }
  0x84   : > { %1210 = vmatpush.msra.mxu2 %v1169_v17  ;;  %1251 = vmatpush.msra.mxu3 %v1185_v18  ;;  %v1178_v17 = vld [vmem:[%s2218_s9 + $0x80] sm:$0xff] }
  0x86   : > { %1211 = vmatpush.msra.mxu2 %v1168_v22  ;;  %1252 = vmatpush.msra.mxu3 %v1184_v23 }
  0x88   : > { %1212 = vmatpush.msra.mxu2 %v1167_v28  ;;  %1253 = vmatpush.msra.mxu3 %v1183_v29 }
  0x8a   : > { %1213 = vmatpush.msra.mxu2 %v1166_v32  ;;  %1254 = vmatpush.msra.mxu3 %v1182_v33 }
  0x8b   : > { %459 = vmatmul.f32.gmra.mxu0 %v395_v34  ;;  %500 = vmatmul.f32.gmra.mxu1 %v395_v34 }
  0x8c   : > { %1214 = vmatpush.msra.mxu2 %v1165_v41  ;;  %1255 = vmatpush.msra.mxu3 %v1181_v44 }
  0x8e   : > { %1215 = vmatpush.msra.mxu2 %v1164_v54 }
  0x90   : > { %1216 = vmatpush.msra.mxu2 %v1163_v62 }
  0x93   : > { %462 = vmatmul.f32.gmra.mxu0 %v396_v35  ;;  %503 = vmatmul.f32.gmra.mxu1 %v396_v35 }
  0x9b   : > { %465 = vmatmul.f32.gmra.mxu0 %v397_v36  ;;  %506 = vmatmul.f32.gmra.mxu1 %v397_v36 }
  0xa3   : > { %468 = vmatmul.f32.gmra.mxu0 %v398_v37  ;;  %509 = vmatmul.f32.gmra.mxu1 %v398_v37 }
  0xab   : > { %471 = vmatmul.f32.gmra.mxu0 %v399_v38  ;;  %512 = vmatmul.f32.gmra.mxu1 %v399_v38 }
  0xb3   : > { %474 = vmatmul.f32.gmra.mxu0 %v400_v39  ;;  %515 = vmatmul.f32.gmra.mxu1 %v400_v39 }
  0xbb   : > { %477 = vmatmul.f32.gmra.mxu0 %v401_v40  ;;  %518 = vmatmul.f32.gmra.mxu1 %v401_v40 }
 0x100   : > { %v457_v46 = vpop.f32.mrf.mxu0  ;;  %v498_v47 = vpop.f32.mrf.mxu1 }
 0x101   : > { %v2275_v48 = vadd.f32 %v457_v46, %v2268_v42  ;;  %v2278_v49 = vadd.f32 %v498_v47, %v2270_v43 }
 0x103   : > { %v2283_v52 = vmul.f32 0.70710677, %v2275_v48  ;;  %v2291_v56 = vmul.f32 0.70710677, %v2278_v49  ;;  %v2373_v51 = vmul.f32 0.5, %v2275_v48  ;;  %v2394_v4 = vmul.f32 0.5, %v2278_v49 }
 0x105   : > { %v2288_v55 = vand.u32 2147483647, %v2283_v52  ;;  %v539_v0 = vand.u32 2147483647, %v2291_v56  ;;  %vm1066_vm13 = vcmp.ge.f32.partialorder %v2283_v52, 0.0 }
 0x107   : > { %v554_v63 = vmul.f32 0.3275911, %v2288_v55  ;;  %v555_v8 = vmul.f32 0.3275911, %v539_v0  ;;  %v970_v24 = vsub.f32 0.0, %v2288_v55  ;;  %v971_v30 = vsub.f32 0.0, %v539_v0 }
 0x108   : > { %v460_v59 = vpop.f32.mrf.mxu0  ;;  %v501_v60 = vpop.f32.mrf.mxu1 }
 0x109   : > { %v2300_v1 = vadd.f32 %v460_v59, %v2268_v42  ;;  %v2303_v2 = vadd.f32 %v501_v60, %v2270_v43  ;;  %v2311_v7 = vadd.f32 1.0, %v554_v63  ;;  %v2328_v19 = vadd.f32 1.0, %v555_v8  ;;  %v1179_v63 = vld [vmem:[%s2218_s9 + $0x88] sm:$0xff] }
 0x10a   : > { %v986_v35 = vmul.f32 %v970_v24, %v2288_v55  ;;  %v987_v45 = vmul.f32 %v971_v30, %v539_v0  ;;  %v1180_v55 = vld [vmem:[%s2218_s9 + $0x90] sm:$0xff] }
 0x10b   : > { %v2308_v5 = vmul.f32 0.70710677, %v2300_v1  ;;  %v2314_v9 = vmul.f32 0.70710677, %v2303_v2  ;;  %1655 = vrcp.f32 %v2311_v7  ;;  %1256 = vmatpush.msra.mxu3 %v1180_v55  ;;  %v597_v0 = vand.u32 2147483648, %v2311_v7 }
 0x10c   : > { %1657 = vrcp.f32 %v2328_v19  ;;  %v1002_v58 = vmul.f32 1.442695, %v986_v35  ;;  %v1004_v3 = vmul.f32 1.442695, %v987_v45  ;;  %v2397_v6 = vmul.f32 0.5, %v2300_v1 }
 0x10d   : > { %v2318_v11 = vand.u32 2147483647, %v2308_v5  ;;  %v2323_v14 = vand.u32 2147483647, %v2314_v9  ;;  %1257 = vmatpush.msra.mxu3 %v1179_v63  ;;  %v2407_v49 = vmul.f32 0.5, %v2303_v2  ;;  %vm591_vm0 = vweird.f32 %v2311_v7 }
 0x10e   : > { %3280 = vst [vmem:[#allocation30_spill] sm:$0xff] %v2397_v6  ;;  %v595_v2 = vand.u32 2147483647, %v2311_v7  ;;  %vm606_vm4 = vweird.f32 %v2328_v19 }
 0x10f   : > { %v556_v21 = vmul.f32 0.3275911, %v2318_v11  ;;  %v557_v27 = vmul.f32 0.3275911, %v2323_v14  ;;  %v972_v53 = vsub.f32 0.0, %v2318_v11  ;;  %v973_v48 = vsub.f32 0.0, %v2323_v14  ;;  %1258 = vmatpush.msra.mxu3 %v1178_v17 }
 0x110   : > { %v463_v15 = vpop.f32.mrf.mxu0  ;;  %v504_v16 = vpop.f32.mrf.mxu1  ;;  %3281 = vst [vmem:[#allocation31_spill] sm:$0xff] %v2407_v49  ;;  %vm2485_vm3 = vcmp.eq.f32.partialorder %v595_v2, 8.507059e+37 }
 0x111   : > { %v2331_v20 = vadd.f32 %v463_v15, %v2268_v42  ;;  %v2341_v26 = vadd.f32 %v504_v16, %v2270_v43  ;;  %v2347_v31 = vadd.f32 1.0, %v556_v21  ;;  %v2351_v34 = vpop.eup %1655  ;;  %v2360_v38 = vadd.f32 1.0, %v557_v27  ;;  %v1162_v16 = vld [vmem:[%s2218_s9] sm:$0xff] }
 0x112   : > { %v587_v50 = vmul.f32 %v2351_v34, %v2311_v7  ;;  %v2379_v57 = vpop.eup %1657  ;;  %v988_v13 = vmul.f32 %v972_v53, %v2318_v11  ;;  %1217 = vmatpush.msra.mxu2 %v1162_v16  ;;  %v989_v11 = vmul.f32 %v973_v48, %v2323_v14  ;;  %v2420_v27 = vor.u32 1.1754944e-38, %v597_v0 }
 0x113   : > { %v2338_v25 = vmul.f32 0.70710677, %v2331_v20  ;;  %v2358_v37 = vmul.f32 0.70710677, %v2341_v26  ;;  %1659 = vrcp.f32 %v2347_v31  ;;  %v602_v12 = vmul.f32 %v2379_v57, %v2328_v19 }
 0x114   : > { %1661 = vrcp.f32 %v2360_v38  ;;  %v588_v10 = vsub.f32 1.0, %v587_v50  ;;  %v1008_v50 = vmul.f32 1.442695, %v989_v11  ;;  %vm592_vm1 = vweird.f32 %v2351_v34 }
 0x115   : > { %v2355_v36 = vand.u32 2147483647, %v2338_v25  ;;  %3278 = vst [vmem:[#allocation28_spill] sm:$0xff] %v2358_v37  ;;  %v2365_v46 = vand.u32 2147483647, %v2358_v37  ;;  %1663 = vpow2.f32 %v1002_v58  ;;  %v603_v35 = vsub.f32 1.0, %v602_v12  ;;  %vm2474_vm2 = vmor %vm591_vm0, %vm592_vm1 }
 0x116   : > { %v589_v33 = vmul.f32 %v2351_v34, %v588_v10  ;;  %v2460_v10 = vmul.f32 0.5, %v2331_v20  ;;  %vm621_vm5 = vweird.f32 %v2347_v31  ;;  %vm607_vm6 = vweird.f32 %v2379_v57 }
 0x117   : > { %v558_v59 = vmul.f32 0.3275911, %v2355_v36  ;;  %v559_v8 = vmul.f32 0.3275911, %v2365_v46  ;;  %v974_v18 = vsub.f32 0.0, %v2355_v36  ;;  %v975_v29 = vsub.f32 0.0, %v2365_v46  ;;  %vm2687_vm8 = vmor %vm606_vm4, %vm607_vm6 }
 0x118   : > { %v466_v39 = vpop.f32.mrf.mxu0  ;;  %v507_v40 = vpop.f32.mrf.mxu1  ;;  %v604_v48 = vmul.f32 %v2379_v57, %v603_v35  ;;  %v2455_v63 = vadd.f32 %v2351_v34, %v589_v33  ;;  %3285 = vst [vmem:[#allocation35_spill] sm:$0xff] %v2460_v10  ;;  %vm636_vm7 = vweird.f32 %v2360_v38 }
 0x119   : > { %v2368_v47 = vadd.f32 %v466_v39, %v2268_v42  ;;  %v2388_v61 = vadd.f32 %v507_v40, %v2270_v43  ;;  %v2409_v1 = vadd.f32 1.0, %v558_v59  ;;  %v2412_v21 = vpop.eup %1659  ;;  %v2422_v28 = vadd.f32 1.0, %v559_v8 }
 0x11a   : > { %v2431_v14 = vpop.eup %1661  ;;  %v1006_v39 = vmul.f32 1.442695, %v988_v13  ;;  %v617_v41 = vmul.f32 %v2412_v21, %v2347_v31  ;;  %v990_v44 = vmul.f32 %v974_v18, %v2355_v36  ;;  %v991_v59 = vmul.f32 %v975_v29, %v2365_v46 }
 0x11b   : > { %v2383_v60 = vmul.f32 0.70710677, %v2368_v47  ;;  %v2417_v22 = vmul.f32 0.70710677, %v2388_v61  ;;  %1665 = vrcp.f32 %v2409_v1  ;;  %v2445_v55 = vpop.eup %1663  ;;  %v632_v58 = vmul.f32 %v2431_v14, %v2360_v38 }
 0x11c   : > { %1667 = vpow2.f32 %v1004_v3  ;;  %v618_v0 = vsub.f32 1.0, %v617_v41  ;;  %v1010_v3 = vmul.f32 1.442695, %v990_v44  ;;  %v1012_v11 = vmul.f32 1.442695, %v991_v59 }
 0x11d   : > { %3279 = vst [vmem:[#allocation29_spill] sm:$0xff] %v2383_v60  ;;  %v544_v15 = vand.u32 2147483647, %v2383_v60  ;;  %v545_v53 = vand.u32 2147483647, %v2417_v22  ;;  %1669 = vrcp.f32 %v2422_v28  ;;  %v633_v18 = vsub.f32 1.0, %v632_v58 }
 0x11e   : > { %3282 = vst [vmem:[#allocation32_spill] sm:$0xff] %v2417_v22  ;;  %1671 = vpow2.f32 %v1006_v39  ;;  %v2490_v7 = vadd.f32 %v2379_v57, %v604_v48  ;;  %v2495_v39 = vmul.f32 %v2412_v21, %v618_v0  ;;  %vm651_vm10 = vweird.f32 %v2409_v1 }
 0x11f   : > { %v560_v40 = vmul.f32 0.3275911, %v544_v15  ;;  %v976_v36 = vsub.f32 0.0, %v544_v15  ;;  %1673 = vpow2.f32 %v1008_v50  ;;  %v561_v46 = vmul.f32 0.3275911, %v545_v53 }
 0x120   : > { %v469_v23 = vpop.f32.mrf.mxu0  ;;  %v510_v24 = vpop.f32.mrf.mxu1  ;;  %v977_v33 = vsub.f32 0.0, %v545_v53  ;;  %v2511_v59 = vmul.f32 %v2431_v14, %v633_v18  ;;  %vm622_vm11 = vweird.f32 %v2412_v21  ;;  %vm637_vm15 = vweird.f32 %v2431_v14 }
 0x121   : > { %v2426_v30 = vadd.f32 %v469_v23, %v2268_v42  ;;  %v2429_v32 = vadd.f32 %v510_v24, %v2270_v43  ;;  %v2452_v62 = vadd.f32 1.0, %v560_v40  ;;  %v2465_v17 = vpop.eup %1665  ;;  %v2468_v23 = vmul.f32 0.5, %v2341_v26  ;;  %vm2723_vm12 = vmor %vm621_vm5, %vm622_vm11 }
 0x122   : > { %v992_v24 = vmul.f32 %v976_v36, %v544_v15  ;;  %v2478_v29 = vpop.eup %1667  ;;  %v594_v26 = vsel %vm2474_vm2, %v2351_v34, %v2455_v63  ;;  %v2498_v40 = vmul.f32 0.5, %v2368_v47  ;;  %v647_v34 = vmul.f32 %v2465_v17, %v2409_v1  ;;  %vm2754_vm1 = vmor %vm636_vm7, %vm637_vm15 }
 0x123   : > { %v2439_v45 = vmul.f32 0.70710677, %v2426_v30  ;;  %v2443_v54 = vmul.f32 0.70710677, %v2429_v32  ;;  %3286 = vst [vmem:[#allocation36_spill] sm:$0xff] %v2468_v23  ;;  %1675 = vrcp.f32 %v2452_v62  ;;  %v2492_v35 = vpop.eup %1669  ;;  %v2502_v2 = vadd.f32 1.0, %v561_v46 }
 0x124   : > { %1677 = vpow2.f32 %v1010_v3  ;;  %3291 = vst [vmem:[#allocation37_spill] sm:$0xff] %v2498_v40  ;;  %v2508_v58 = vpop.eup %1671  ;;  %v1014_v36 = vmul.f32 1.442695, %v992_v24  ;;  %v662_v63 = vmul.f32 %v2492_v35, %v2422_v28  ;;  %v993_v0 = vmul.f32 %v977_v33, %v545_v53 }
 0x125   : > { %3283 = vst [vmem:[#allocation33_spill] sm:$0xff] %v2439_v45  ;;  %v546_v8 = vand.u32 2147483647, %v2439_v45  ;;  %v2463_v12 = vand.u32 2147483647, %v2443_v54  ;;  %1679 = vpow2.f32 %v1012_v11  ;;  %v2516_v48 = vpop.eup %1673  ;;  %v2529_v11 = vmul.f32 0.5, %v2426_v30 }
 0x126   : > { %3284 = vst [vmem:[#allocation34_spill] sm:$0xff] %v2443_v54  ;;  %v648_v20 = vsub.f32 1.0, %v647_v34  ;;  %1681 = vrcp.f32 %v2502_v2  ;;  %v1016_v34 = vmul.f32 1.442695, %v993_v0  ;;  %vm666_vm0 = vweird.f32 %v2422_v28 }
 0x127   : > { %v562_v41 = vmul.f32 0.3275911, %v546_v8  ;;  %v563_v44 = vmul.f32 0.3275911, %v2463_v12  ;;  %v978_v3 = vsub.f32 0.0, %v546_v8  ;;  %3295 = vst [vmem:[#allocation41_spill] sm:$0xff] %v2529_v11  ;;  %1683 = vpow2.f32 %v1014_v36 }
 0x128   : > { %v472_v13 = vpop.f32.mrf.mxu0  ;;  %v513_v16 = vpop.f32.mrf.mxu1  ;;  %v979_v30 = vsub.f32 0.0, %v2463_v12  ;;  %v663_v11 = vsub.f32 1.0, %v662_v63  ;;  %v2566_v0 = vmul.f32 %v2465_v17, %v648_v20  ;;  %vm681_vm4 = vweird.f32 %v2452_v62 }
 0x129   : > { %v2506_v50 = vadd.f32 %v472_v13, %v2268_v42  ;;  %v2514_v47 = vadd.f32 %v513_v16, %v2270_v43  ;;  %v2524_v13 = vmul.f32 0.5, %v2388_v61  ;;  %v2526_v18 = vadd.f32 1.0, %v562_v41  ;;  %v2534_v24 = vpop.eup %1675 }
 0x12a   : > { %v2537_v53 = vadd.f32 1.0, %v563_v44  ;;  %v994_v45 = vmul.f32 %v978_v3, %v546_v8  ;;  %v995_v3 = vmul.f32 %v979_v30, %v2463_v12  ;;  %v2582_v20 = vmul.f32 %v2492_v35, %v663_v11 }
 0x12b   : > { %3292 = vst [vmem:[#allocation38_spill] sm:$0xff] %v2514_v47  ;;  %v2521_v46 = vmul.f32 0.70710677, %v2506_v50  ;;  %v2532_v16 = vmul.f32 0.70710677, %v2514_v47  ;;  %1685 = vrcp.f32 %v2526_v18  ;;  %v2585_v30 = vmul.f32 0.5, %v2429_v32 }
 0x12c   : > { %3294 = vst [vmem:[#allocation40_spill] sm:$0xff] %v2524_v13  ;;  %v2540_v13 = vpop.eup %1677  ;;  %1687 = vrcp.f32 %v2537_v53  ;;  %v1018_v12 = vmul.f32 1.442695, %v994_v45  ;;  %v1020_v11 = vmul.f32 1.442695, %v995_v3  ;;  %vm667_vm7 = vweird.f32 %v2492_v35 }
 0x12d   : > { %3293 = vst [vmem:[#allocation39_spill] sm:$0xff] %v2521_v46  ;;  %v548_v33 = vand.u32 2147483647, %v2521_v46  ;;  %v549_v41 = vand.u32 2147483647, %v2532_v16  ;;  %v2547_v44 = vpop.eup %1679  ;;  %v2551_v46 = vmul.f32 %v2534_v24, %v2452_v62  ;;  %v672_v52 = vand.u32 2147483648, %v2422_v28 }
 0x12e   : > { %3296 = vst [vmem:[#allocation42_spill] sm:$0xff] %v2532_v16  ;;  %v2557_v16 = vsel %vm2485_vm3, %v2420_v27, %v594_v26  ;;  %v2574_v27 = vpop.eup %1681  ;;  %vm652_vm3 = vweird.f32 %v2465_v17  ;;  %vm1067_vm11 = vcmp.ge.f32.partialorder %v2291_v56, 0.0  ;;  %vm1068_vm15 = vcmp.ge.f32.partialorder %v2308_v5, 0.0 }
 0x12f   : > { %3297 = vst [vmem:[#allocation43_spill] sm:$0xff] %v2540_v13  ;;  %v564_v40 = vmul.f32 0.3275911, %v548_v33  ;;  %v565_v36 = vmul.f32 0.3275911, %v549_v41  ;;  %v980_v8 = vsub.f32 0.0, %v548_v33  ;;  %vm2775_vm5 = vmor %vm651_vm10, %vm652_vm3 }
 0x130   : > { %v475_v54 = vpop.f32.mrf.mxu0  ;;  %v516_v61 = vpop.f32.mrf.mxu1  ;;  %3299 = vst [vmem:[#allocation45_spill] sm:$0xff] %v2547_v44  ;;  %v981_v26 = vsub.f32 0.0, %v549_v41  ;;  %v732_v5 = vand.u32 2147483648, %v2537_v53 }
 0x131   : > { %v2545_v47 = vadd.f32 %v475_v54, %v2268_v42  ;;  %v2560_v54 = vadd.f32 1.0, %v564_v40  ;;  %v2569_v23 = vadd.f32 1.0, %v565_v36  ;;  %v2572_v22 = vadd.f32 %v516_v61, %v2270_v43  ;;  %3305 = vst [vmem:[#allocation51_spill] sm:$0xff] %v2585_v30 }
 0x132   : > { %v826_v40 = vmul.f32 1.0614054, %v2557_v16  ;;  %v678_v61 = vsub.f32 1.0, %v2551_v46  ;;  %v996_v36 = vmul.f32 %v980_v8, %v548_v33  ;;  %v997_v30 = vmul.f32 %v981_v26, %v549_v41 }
 0x133   : > { %3298 = vst [vmem:[#allocation44_spill] sm:$0xff] %v2545_v47  ;;  %v2563_v63 = vmul.f32 0.70710677, %v2545_v47  ;;  %1689 = vrcp.f32 %v2560_v54  ;;  %v2579_v47 = vpop.eup %1683  ;;  %v2594_v45 = vmul.f32 0.70710677, %v2572_v22 }
 0x134   : > { %3300 = vst [vmem:[#allocation46_spill] sm:$0xff] %v2560_v54  ;;  %1691 = vrcp.f32 %v2569_v23  ;;  %v2589_v49 = vpop.eup %1685  ;;  %v842_v33 = vadd.f32 -1.4531521, %v826_v40 }
 0x135   : > { %3301 = vst [vmem:[#allocation47_spill] sm:$0xff] %v2563_v63  ;;  %v550_v15 = vand.u32 2147483647, %v2563_v63  ;;  %1693 = vpow2.f32 %v1016_v34  ;;  %v2596_v32 = vpop.eup %1687  ;;  %v2604_v34 = vmul.f32 0.5, %v2506_v50  ;;  %v551_v8 = vand.u32 2147483647, %v2594_v45 }
 0x136   : > { %3302 = vst [vmem:[#allocation48_spill] sm:$0xff] %v2569_v23  ;;  %1695 = vpow2.f32 %v1018_v12  ;;  %v707_v41 = vmul.f32 %v2589_v49, %v2526_v18  ;;  %v722_v50 = vmul.f32 %v2596_v32, %v2537_v53  ;;  %v1024_v12 = vmul.f32 1.442695, %v997_v30 }
 0x137   : > { %3303 = vst [vmem:[#allocation49_spill] sm:$0xff] %v2572_v22  ;;  %v566_v10 = vmul.f32 0.3275911, %v550_v15  ;;  %v982_v44 = vsub.f32 0.0, %v550_v15  ;;  %v983_v37 = vsub.f32 0.0, %v551_v8 }
 0x138   : > { %3304 = vst [vmem:[#allocation50_spill] sm:$0xff] %v2579_v47  ;;  %v478_v60 = vpop.f32.mrf.mxu0  ;;  %v519_v63 = vpop.f32.mrf.mxu1  ;;  %v692_v47 = vmul.f32 %v2574_v27, %v2502_v2 }
 0x139   : > { %3306 = vst [vmem:[#allocation52_spill] sm:$0xff] %v2594_v45  ;;  %v2598_v6 = vadd.f32 1.0, %v566_v10  ;;  %v2601_v46 = vadd.f32 %v478_v60, %v2268_v42  ;;  %v2608_v3 = vadd.f32 %v519_v63, %v2270_v43  ;;  %v2610_v22 = vpop.eup %1689  ;;  %v1022_v10 = vmul.f32 1.442695, %v996_v36 }
 0x13a   : > { %3308 = vst [vmem:[#allocation54_spill] sm:$0xff] %v2604_v34  ;;  %v2618_v60 = vpop.eup %1691  ;;  %v998_v26 = vmul.f32 %v982_v44, %v550_v15  ;;  %v567_v43 = vmul.f32 0.3275911, %v551_v8  ;;  %v693_v40 = vsub.f32 1.0, %v692_v47  ;;  %v737_v45 = vmul.f32 %v2610_v22, %v2560_v54 }
 0x13b   : > { %3307 = vst [vmem:[#allocation53_spill] sm:$0xff] %v2601_v46  ;;  %1697 = vrcp.f32 %v2598_v6  ;;  %v2616_v42 = vmul.f32 0.70710677, %v2601_v46  ;;  %v2622_v63 = vpop.eup %1693  ;;  %v858_v46 = vmul.f32 %v842_v33, %v2557_v16  ;;  %v2634_v44 = vmul.f32 0.70710677, %v2608_v3 }
 0x13c   : > { %3309 = vst [vmem:[#allocation55_spill] sm:$0xff] %v2608_v3  ;;  %1699 = vpow2.f32 %v1020_v11  ;;  %v2631_v34 = vadd.f32 1.0, %v567_v43  ;;  %v708_v15 = vsub.f32 1.0, %v707_v41  ;;  %v752_v47 = vmul.f32 %v2618_v60, %v2569_v23  ;;  %v2639_v11 = vpop.eup %1695 }
 0x13d   : > { %3310 = vst [vmem:[#allocation56_spill] sm:$0xff] %v2616_v42  ;;  %v2626_v36 = vand.u32 2147483647, %v2616_v42  ;;  %1701 = vpow2.f32 %v1022_v10  ;;  %v2642_v33 = vmul.f32 %v2534_v24, %v678_v61  ;;  %v723_v42 = vsub.f32 1.0, %v722_v50 }
 0x13e   : > { %3311 = vst [vmem:[#allocation57_spill] sm:$0xff] %v2622_v63  ;;  %v1026_v63 = vmul.f32 1.442695, %v998_v26  ;;  %1703 = vrcp.f32 %v2631_v34  ;;  %v2649_v41 = vmul.f32 %v2574_v27, %v693_v40  ;;  %v2654_v3 = vand.u32 2147483647, %v2634_v44 }
 0x13f   : > { %3312 = vst [vmem:[#allocation58_spill] sm:$0xff] %v2626_v36  ;;  %v568_v30 = vmul.f32 0.3275911, %v2626_v36  ;;  %1705 = vpow2.f32 %v1024_v12  ;;  %v738_v61 = vsub.f32 1.0, %v737_v45  ;;  %v999_v26 = vmul.f32 %v983_v37, %v551_v8 }
 0x140   : > { %3313 = vst [vmem:[#allocation59_spill] sm:$0xff] %v2634_v44  ;;  %v874_v23 = vadd.f32 1.4214138, %v858_v46  ;;  %v2661_v54 = vmul.f32 %v2589_v49, %v708_v15  ;;  %v753_v13 = vsub.f32 1.0, %v752_v47  ;;  %v569_v40 = vmul.f32 0.3275911, %v2654_v3 }
 0x141   : > { %3314 = vst [vmem:[#allocation60_spill] sm:$0xff] %v2639_v11  ;;  %v2645_v43 = vpop.eup %1697  ;;  %v2651_v10 = vadd.f32 1.0, %v568_v30  ;;  %v2666_v12 = vmul.f32 %v2596_v32, %v723_v42  ;;  %v610_v8 = vand.u32 2147483647, %v2328_v19  ;;  %v612_v15 = vand.u32 2147483648, %v2328_v19 }
 0x142   : > { %3315 = vst [vmem:[#allocation61_spill] sm:$0xff] %v2654_v3  ;;  %v2656_v11 = vpop.eup %1699  ;;  %v767_v50 = vmul.f32 %v2645_v43, %v2598_v6  ;;  %v890_v30 = vmul.f32 %v874_v23, %v2557_v16  ;;  %v2674_v46 = vadd.f32 1.0, %v569_v40  ;;  %v2681_v42 = vmul.f32 %v2610_v22, %v738_v61 }
 0x143   : > { %3316 = vst [vmem:[#allocation62_spill] sm:$0xff] %v2656_v11  ;;  %1707 = vrcp.f32 %v2651_v10  ;;  %v2670_v45 = vpop.eup %1701  ;;  %v2694_v37 = vmul.f32 %v2618_v60, %v753_v13  ;;  %v609_v61 = vsel %vm2687_vm8, %v2379_v57, %v2490_v7  ;;  %vm611_vm9 = vcmp.eq.f32.partialorder %v610_v8, 8.507059e+37 }
 0x144   : > { %1709 = vpow2.f32 %v1026_v63  ;;  %3317 = vst [vmem:[#allocation63_spill] sm:$0xff] %v2670_v45  ;;  %v2678_v47 = vpop.eup %1703  ;;  %v768_v23 = vsub.f32 1.0, %v767_v50  ;;  %v2683_v63 = vmul.f32 1.442695, %v999_v26  ;;  %v906_v44 = vadd.f32 -0.28449672, %v890_v30 }
 0x145   : > { %v2691_v40 = vpop.eup %1705  ;;  %v782_v45 = vmul.f32 %v2678_v47, %v2631_v34  ;;  %1711 = vrcp.f32 %v2674_v46  ;;  %v613_v50 = vor.u32 1.1754944e-38, %v612_v15  ;;  %v620_v26 = vadd.f32 %v2412_v21, %v2495_v39 }
 0x146   : > { %3318 = vst [vmem:[#allocation64_spill] sm:$0xff] %v2683_v63  ;;  %v922_v19 = vmul.f32 %v906_v44, %v2557_v16  ;;  %v625_v63 = vand.u32 2147483647, %v2347_v31  ;;  %v2715_v57 = vmul.f32 %v2645_v43, %v768_v23  ;;  %v642_v11 = vand.u32 2147483648, %v2360_v38 }
 0x147   : > { %3321 = vst [vmem:[#allocation65_spill] sm:$0xff] %v2691_v40  ;;  %v783_v13 = vsub.f32 1.0, %v782_v45  ;;  %v627_v40 = vand.u32 2147483648, %v2347_v31  ;;  %v2719_v44 = vsel %vm611_vm9, %v613_v50, %v609_v61  ;;  %v624_v23 = vsel %vm2723_vm12, %v2412_v21, %v620_v26  ;;  %vm668_vm9 = vmor %vm666_vm0, %vm667_vm7 }
 0x148   : > { %v938_v39 = vadd.f32 0.2548296, %v922_v19  ;;  %v827_v15 = vmul.f32 1.0614054, %v2719_v44  ;;  %vm626_vm14 = vcmp.eq.f32.partialorder %v625_v63, 8.507059e+37  ;;  %v635_v50 = vadd.f32 %v2431_v14, %v2511_v59 }
 0x149   : > { %v2706_v30 = vpop.eup %1707  ;;  %v2729_v8 = vmul.f32 %v2678_v47, %v783_v13  ;;  %v628_v31 = vor.u32 1.1754944e-38, %v627_v40  ;;  %v640_v13 = vand.u32 2147483647, %v2360_v38  ;;  %vm696_vm8 = vweird.f32 %v2502_v2 }
 0x14a   : > { %v2712_v3 = vpop.eup %1709  ;;  %v797_v7 = vmul.f32 %v2706_v30, %v2651_v10  ;;  %v954_v19 = vmul.f32 %v938_v39, %v2557_v16  ;;  %v843_v36 = vadd.f32 -1.4531521, %v827_v15  ;;  %v639_v39 = vsel %vm2754_vm1, %v2431_v14, %v635_v50 }
 0x14b   : > { %3322 = vst [vmem:[#allocation66_spill] sm:$0xff] %v2712_v3  ;;  %v2738_v3 = vpop.eup %1711  ;;  %v2750_v59 = vsel %vm626_vm14, %v628_v31, %v624_v23  ;;  %vm641_vm2 = vcmp.eq.f32.partialorder %v640_v13, 8.507059e+37  ;;  %v650_v23 = vadd.f32 %v2465_v17, %v2566_v0  ;;  %v657_v0 = vand.u32 2147483648, %v2409_v1 }
 0x14c   : > { %v798_v61 = vsub.f32 1.0, %v797_v7  ;;  %v812_v16 = vmul.f32 %v2738_v3, %v2674_v46  ;;  %v1034_v63 = vmul.f32 %v2445_v55, %v954_v19  ;;  %v859_v26 = vmul.f32 %v843_v36, %v2719_v44 }
 0x14d   : > { %v828_v7 = vmul.f32 1.0614054, %v2750_v59  ;;  %v643_v55 = vor.u32 1.1754944e-38, %v642_v11  ;;  %v655_v19 = vand.u32 2147483647, %v2409_v1  ;;  %v673_v11 = vor.u32 1.1754944e-38, %v672_v52 }
 0x14e   : > { %v2745_v21 = vmul.f32 %v2706_v30, %v798_v61  ;;  %v813_v45 = vsub.f32 1.0, %v812_v16  ;;  %v1050_v15 = vsub.f32 1.0, %v1034_v63  ;;  %v875_v38 = vadd.f32 1.4214138, %v859_v26 }
 0x14f   : > { %v844_v61 = vadd.f32 -1.4531521, %v828_v7  ;;  %v2771_v14 = vsel %vm641_vm2, %v643_v55, %v639_v39  ;;  %v654_v63 = vsel %vm2775_vm5, %v2465_v17, %v650_v23  ;;  %vm656_vm6 = vcmp.eq.f32.partialorder %v655_v19, 8.507059e+37 }
 0x150   : > { %v2769_v36 = vmul.f32 %v2738_v3, %v813_v45  ;;  %v1082_v31 = vsub.f32 0.0, %v1050_v15  ;;  %v891_v50 = vmul.f32 %v875_v38, %v2719_v44  ;;  %v829_v16 = vmul.f32 1.0614054, %v2771_v14 }
 0x151   : > { %v860_v13 = vmul.f32 %v844_v61, %v2750_v59  ;;  %v658_v26 = vor.u32 1.1754944e-38, %v657_v0  ;;  %v665_v7 = vadd.f32 %v2492_v35, %v2582_v20  ;;  %v670_v17 = vand.u32 2147483647, %v2422_v28 }
 0x152   : > { %v1098_v40 = vsel %vm1066_vm13, %v1050_v15, %v1082_v31  ;;  %v907_v1 = vadd.f32 -0.28449672, %v891_v50  ;;  %v845_v55 = vadd.f32 -1.4531521, %v829_v16  ;;  %vm682_vm12 = vweird.f32 %v2534_v24 }
 0x153   : > { %v1130_v39 = vadd.f32 1.0, %v1098_v40  ;;  %v876_v45 = vadd.f32 1.4214138, %v860_v13  ;;  %v2792_v38 = vsel %vm656_vm6, %v658_v26, %v654_v63  ;;  %v669_v31 = vsel %vm668_vm9, %v2492_v35, %v665_v7  ;;  %vm2817_vm13 = vmor %vm681_vm4, %vm682_vm12 }
 0x154   : > { %v923_v23 = vmul.f32 %v907_v1, %v2719_v44  ;;  %v830_v61 = vmul.f32 1.0614054, %v2792_v38  ;;  %v861_v19 = vmul.f32 %v845_v55, %v2771_v14  ;;  %vm671_vm10 = vcmp.eq.f32.partialorder %v670_v17, 8.507059e+37 }
 0x155   : > { %v1146_v15 = vmul.f32 %v1130_v39, %v2373_v51  ;;  %v892_v20 = vmul.f32 %v876_v45, %v2750_v59  ;;  %v680_v51 = vadd.f32 %v2534_v24, %v2642_v33  ;;  %v2807_v63 = vsel %vm671_vm10, %v673_v11, %v669_v31 }
 0x156   : > { %v939_v0 = vadd.f32 0.2548296, %v923_v23  ;;  %v846_v13 = vadd.f32 -1.4531521, %v830_v61  ;;  %v877_v16 = vadd.f32 1.4214138, %v861_v19  ;;  %v695_v61 = vadd.f32 %v2574_v27, %v2649_v41 }
 0x157   : > { %1218 = vmatmul.f32.vlgmr.msra.gmra.mxu2 %v1146_v15  ;;  %v908_v50 = vadd.f32 -0.28449672, %v892_v20  ;;  %v685_v28 = vand.u32 2147483647, %v2452_v62  ;;  %v831_v7 = vmul.f32 1.0614054, %v2807_v63  ;;  %v684_v1 = vsel %vm2817_vm13, %v2534_v24, %v680_v51 }
 0x158   : > { %v955_v35 = vmul.f32 %v939_v0, %v2719_v44  ;;  %v862_v26 = vmul.f32 %v846_v13, %v2792_v38  ;;  %v893_v39 = vmul.f32 %v877_v16, %v2771_v14  ;;  %v687_v45 = vand.u32 2147483648, %v2452_v62 }
 0x159   : > { %v924_v40 = vmul.f32 %v908_v50, %v2750_v59  ;;  %vm2825_vm14 = vcmp.eq.f32.partialorder %v685_v28, 8.507059e+37  ;;  %v847_v15 = vadd.f32 -1.4531521, %v831_v7  ;;  %vm697_vm0 = vweird.f32 %v2574_v27 }
 0x15a   : > { %v1035_v55 = vmul.f32 %v2478_v29, %v955_v35  ;;  %v878_v52 = vadd.f32 1.4214138, %v862_v26  ;;  %v909_v23 = vadd.f32 -0.28449672, %v893_v39  ;;  %v688_v20 = vor.u32 1.1754944e-38, %v687_v45  ;;  %vm2840_vm1 = vmor %vm696_vm8, %vm697_vm0 }
 0x15b   : > { %v940_v17 = vadd.f32 0.2548296, %v924_v40  ;;  %v863_v62 = vmul.f32 %v847_v15, %v2807_v63  ;;  %vm711_vm2 = vweird.f32 %v2526_v18  ;;  %v700_v0 = vand.u32 2147483647, %v2502_v2 }
 0x15c   : > { %v1051_v24 = vsub.f32 1.0, %v1035_v55  ;;  %v894_v31 = vmul.f32 %v878_v52, %v2792_v38  ;;  %v925_v11 = vmul.f32 %v909_v23, %v2771_v14  ;;  %v2848_v41 = vsel %vm2825_vm14, %v688_v20, %v684_v1 }
 0x15d   : > { %v956_v19 = vmul.f32 %v940_v17, %v2750_v59  ;;  %v699_v59 = vsel %vm2840_vm1, %v2574_v27, %v695_v61  ;;  %v879_v16 = vadd.f32 1.4214138, %v863_v62  ;;  %v832_v35 = vmul.f32 1.0614054, %v2848_v41 }
 0x15e   : > { %v1083_v50 = vsub.f32 0.0, %v1051_v24  ;;  %v910_v51 = vadd.f32 -0.28449672, %v894_v31  ;;  %v941_v28 = vadd.f32 0.2548296, %v925_v11  ;;  %vm2856_vm3 = vcmp.eq.f32.partialorder %v700_v0, 8.507059e+37 }
 0x15f   : > { %v1036_v13 = vmul.f32 %v2508_v58, %v956_v19  ;;  %v702_v26 = vand.u32 2147483648, %v2502_v2  ;;  %vm1069_vm4 = vcmp.ge.f32.partialorder %v2314_v9, 0.0  ;;  %v895_v58 = vmul.f32 %v879_v16, %v2807_v63  ;;  %v3341_v0 = vld [vmem:[#allocation30_spill] sm:$0xff]  ;;  %v3346_v9 = vld [vmem:[#allocation31_spill] sm:$0xff] }
 0x160   : > { %v1099_v27 = vsel %vm1067_vm11, %v1051_v24, %v1083_v50  ;;  %v926_v33 = vmul.f32 %v910_v51, %v2792_v38  ;;  %v957_v1 = vmul.f32 %v941_v28, %v2771_v14  ;;  %v848_v44 = vadd.f32 -1.4531521, %v832_v35  ;;  %v3342_v28 = vld [vmem:[#allocation46_spill] sm:$0xff] }
 0x161   : > { %v1052_v7 = vsub.f32 1.0, %v1036_v13  ;;  %v1131_v39 = vadd.f32 1.0, %v1099_v27  ;;  %v703_v45 = vor.u32 1.1754944e-38, %v702_v26  ;;  %v911_v52 = vadd.f32 -0.28449672, %v895_v58  ;;  %v3357_v27 = vld [vmem:[#allocation32_spill] sm:$0xff] }
 0x162   : > { %v942_v17 = vadd.f32 0.2548296, %v926_v33  ;;  %v710_v2 = vadd.f32 %v2589_v49, %v2661_v54  ;;  %vm1070_vm5 = vcmp.ge.f32.partialorder %v2338_v25, 0.0  ;;  %vm726_vm6 = vweird.f32 %v2537_v53 }
 0x163   : > { %v1084_v55 = vsub.f32 0.0, %v1052_v7  ;;  %v1147_v56 = vmul.f32 %v1131_v39, %v2394_v4  ;;  %v1037_v15 = vmul.f32 %v2516_v48, %v957_v1  ;;  %v864_v23 = vmul.f32 %v848_v44, %v2848_v41  ;;  %v3337_v48 = vld [vmem:[#allocation43_spill] sm:$0xff]  ;;  %v3345_v44 = vld [vmem:[#allocation45_spill] sm:$0xff] }
 0x164   : > { %v2876_v14 = vsel %vm2856_vm3, %v703_v45, %v699_v59  ;;  %v958_v61 = vmul.f32 %v942_v17, %v2792_v38  ;;  %v927_v54 = vmul.f32 %v911_v52, %v2807_v63  ;;  %vm712_vm7 = vweird.f32 %v2589_v49  ;;  %v3340_v59 = vld [vmem:[#allocation28_spill] sm:$0xff] }
 0x165   : > { %v1100_v20 = vsel %vm1068_vm15, %v1052_v7, %v1084_v55  ;;  %v833_v24 = vmul.f32 1.0614054, %v2876_v14  ;;  %1259 = vmatmul.f32.vlgmr.msra.gmra.mxu3 %v1147_v56  ;;  %v1053_v4 = vsub.f32 1.0, %v1037_v15  ;;  %v880_v31 = vadd.f32 1.4214138, %v864_v23  ;;  %vm2887_vm8 = vmor %vm711_vm2, %vm712_vm7  ;;  %v3349_v23 = vld [vmem:[#allocation48_spill] sm:$0xff] }
 0x166   : > { %v1132_v19 = vadd.f32 1.0, %v1100_v20  ;;  %v1038_v62 = vmul.f32 %v3337_v48, %v958_v61  ;;  %v943_v29 = vadd.f32 0.2548296, %v927_v54  ;;  %v715_v38 = vand.u32 2147483647, %v2526_v18 }
 0x167   : > { %v849_v11 = vadd.f32 -1.4531521, %v833_v24  ;;  %vm1071_vm9 = vcmp.ge.f32.partialorder %v3340_v59, 0.0  ;;  %v1085_v13 = vsub.f32 0.0, %v1053_v4  ;;  %v896_v51 = vmul.f32 %v880_v31, %v2848_v41  ;;  %v3350_v24 = vld [vmem:[#allocation29_spill] sm:$0xff] }
 0x168   : > { %v1148_v50 = vmul.f32 %v1132_v19, %v3341_v0  ;;  %v714_v16 = vsel %vm2887_vm8, %v2589_v49, %v710_v2  ;;  %vm741_vm10 = vweird.f32 %v3342_v28  ;;  %v1054_v35 = vsub.f32 1.0, %v1038_v62  ;;  %v3353_v62 = vld [vmem:[#allocation35_spill] sm:$0xff] }
 0x169   : > { %v959_v40 = vmul.f32 %v943_v29, %v2807_v63  ;;  %v865_v26 = vmul.f32 %v849_v11, %v2876_v14  ;;  %vm2901_vm11 = vcmp.eq.f32.partialorder %v715_v38, 8.507059e+37  ;;  %v1101_v7 = vsel %vm1069_vm4, %v1053_v4, %v1085_v13 }
 0x16a   : > { %1221 = vmatmul.f32.gmra.mxu2 %v1148_v50  ;;  %v912_v33 = vadd.f32 -0.28449672, %v896_v51  ;;  %v717_v58 = vand.u32 2147483648, %v2526_v18  ;;  %v725_v49 = vadd.f32 %v2596_v32, %v2666_v12  ;;  %v1133_v39 = vadd.f32 1.0, %v1101_v7  ;;  %v3354_v51 = vld [vmem:[#allocation50_spill] sm:$0xff]  ;;  %v3358_v7 = vld [vmem:[#allocation36_spill] sm:$0xff] }
 0x16b   : > { %v1086_v1 = vsub.f32 0.0, %v1054_v35  ;;  %v1039_v63 = vmul.f32 %v3345_v44, %v959_v40  ;;  %v881_v45 = vadd.f32 1.4214138, %v865_v26  ;;  %vm727_vm12 = vweird.f32 %v2596_v32 }
 0x16c   : > { %v928_v55 = vmul.f32 %v912_v33, %v2848_v41  ;;  %v718_v17 = vor.u32 1.1754944e-38, %v717_v58  ;;  %v730_v52 = vand.u32 2147483647, %v2537_v53  ;;  %v1149_v2 = vmul.f32 %v1133_v39, %v3346_v9  ;;  %vm2920_vm13 = vmor %vm726_vm6, %vm727_vm12 }
 0x16d   : > { %v1102_v18 = vsel %vm1070_vm5, %v1054_v35, %v1086_v1  ;;  %v1055_v56 = vsub.f32 1.0, %v1039_v63  ;;  %v897_v12 = vmul.f32 %v881_v45, %v2876_v14  ;;  %vm756_vm14 = vweird.f32 %v3349_v23 }
 0x16e   : > { %v1134_v20 = vadd.f32 1.0, %v1102_v18  ;;  %v944_v61 = vadd.f32 0.2548296, %v928_v55  ;;  %v2927_v54 = vsel %vm2901_vm11, %v718_v17, %v714_v16  ;;  %v729_v25 = vsel %vm2920_vm13, %v2596_v32, %v725_v49  ;;  %1262 = vmatmul.f32.gmra.mxu3 %v1149_v2  ;;  %v3359_v55 = vld [vmem:[#allocation57_spill] sm:$0xff] }
 0x16f   : > { %vm1072_vm15 = vcmp.ge.f32.partialorder %v3350_v24, 0.0  ;;  %v1087_v19 = vsub.f32 0.0, %v1055_v56  ;;  %v913_v4 = vadd.f32 -0.28449672, %v897_v12  ;;  %v834_v31 = vmul.f32 1.0614054, %v2927_v54 }
 0x170   : > { %vm2934_vm0 = vcmp.eq.f32.partialorder %v730_v52, 8.507059e+37  ;;  %v1150_v29 = vmul.f32 %v1134_v20, %v3353_v62  ;;  %v960_v11 = vmul.f32 %v944_v61, %v2848_v41  ;;  %v740_v32 = vadd.f32 %v2610_v22, %v2681_v42 }
 0x171   : > { %v1103_v38 = vsel %vm1071_vm9, %v1055_v56, %v1087_v19  ;;  %v929_v0 = vmul.f32 %v913_v4, %v2876_v14  ;;  %v850_v50 = vadd.f32 -1.4531521, %v834_v31  ;;  %vm742_vm1 = vweird.f32 %v2610_v22  ;;  %v3364_v31 = vld [vmem:[#allocation37_spill] sm:$0xff] }
 0x172   : > { %vm771_vm2 = vweird.f32 %v2598_v6  ;;  %1224 = vmatmul.f32.gmra.mxu2 %v1150_v29  ;;  %v1135_v13 = vadd.f32 1.0, %v1103_v38  ;;  %v1040_v16 = vmul.f32 %v3354_v51, %v960_v11  ;;  %v733_v41 = vor.u32 1.1754944e-38, %v732_v5  ;;  %vm2951_vm3 = vmor %vm741_vm10, %vm742_vm1  ;;  %v3367_v51 = vld [vmem:[#allocation33_spill] sm:$0xff] }
 0x173   : > { %v745_v42 = vand.u32 2147483647, %v3342_v28  ;;  %v945_v59 = vadd.f32 0.2548296, %v929_v0  ;;  %v866_v35 = vmul.f32 %v850_v50, %v2927_v54  ;;  %v744_v40 = vsel %vm2951_vm3, %v2610_v22, %v740_v32 }
 0x174   : > { %v747_v26 = vand.u32 2147483648, %v3342_v28  ;;  %vm1073_vm4 = vcmp.ge.f32.partialorder %v3357_v27, 0.0  ;;  %v1151_v33 = vmul.f32 %v1135_v13, %v3358_v7  ;;  %v1056_v58 = vsub.f32 1.0, %v1040_v16  ;;  %v3369_v7 = vld [vmem:[#allocation60_spill] sm:$0xff] }
 0x175   : > { %v2965_v49 = vsel %vm2934_vm0, %v733_v41, %v729_v25  ;;  %vm746_vm5 = vcmp.eq.f32.partialorder %v745_v42, 8.507059e+37  ;;  %v961_v39 = vmul.f32 %v945_v59, %v2876_v14  ;;  %v882_v1 = vadd.f32 1.4214138, %v866_v35 }
 0x176   : > { %v835_v44 = vmul.f32 1.0614054, %v2965_v49  ;;  %v748_v63 = vor.u32 1.1754944e-38, %v747_v26  ;;  %v1088_v45 = vsub.f32 0.0, %v1056_v58  ;;  %v755_v22 = vadd.f32 %v2618_v60, %v2694_v37  ;;  %1265 = vmatmul.f32.gmra.mxu3 %v1151_v33 }
 0x177   : > { %vm757_vm6 = vweird.f32 %v2618_v60  ;;  %v760_v28 = vand.u32 2147483647, %v3349_v23  ;;  %v1041_v17 = vmul.f32 %v3359_v55, %v961_v39  ;;  %v898_v52 = vmul.f32 %v882_v1, %v2927_v54 }
 0x178   : > { %v851_v9 = vadd.f32 -1.4531521, %v835_v44  ;;  %v2975_v2 = vsel %vm746_vm5, %v748_v63, %v744_v40  ;;  %vm2979_vm7 = vmor %vm756_vm14, %vm757_vm6  ;;  %vm786_vm8 = vweird.f32 %v2631_v34  ;;  %v1104_v37 = vsel %vm1072_vm15, %v1056_v58, %v1088_v45  ;;  %v3368_v40 = vld [vmem:[#allocation40_spill] sm:$0xff] }
 0x179   : > { %v836_v18 = vmul.f32 1.0614054, %v2975_v2  ;;  %v759_v56 = vsel %vm2979_vm7, %v2618_v60, %v755_v22  ;;  %vm2990_vm9 = vcmp.eq.f32.partialorder %v760_v28, 8.507059e+37  ;;  %v1136_v15 = vadd.f32 1.0, %v1104_v37 }
 0x17a   : > { %v1057_v20 = vsub.f32 1.0, %v1041_v17  ;;  %v914_v61 = vadd.f32 -0.28449672, %v898_v52  ;;  %v867_v25 = vmul.f32 %v851_v9, %v2965_v49  ;;  %v762_v4 = vand.u32 2147483648, %v3349_v23  ;;  %v3372_v52 = vld [vmem:[#allocation34_spill] sm:$0xff] }
 0x17b   : > { %v852_v19 = vadd.f32 -1.4531521, %v836_v18  ;;  %v770_v24 = vadd.f32 %v2645_v43, %v2715_v57  ;;  %vm772_vm10 = vweird.f32 %v2645_v43  ;;  %v1152_v48 = vmul.f32 %v1136_v15, %v3364_v31 }
 0x17c   : > { %v1089_v60 = vsub.f32 0.0, %v1057_v20  ;;  %v930_v62 = vmul.f32 %v914_v61, %v2927_v54  ;;  %v883_v29 = vadd.f32 1.4214138, %v867_v25  ;;  %vm3003_vm11 = vmor %vm771_vm2, %vm772_vm10  ;;  %v763_v23 = vor.u32 1.1754944e-38, %v762_v4  ;;  %v3373_v61 = vld [vmem:[#allocation39_spill] sm:$0xff] }
 0x17d   : > { %v868_v5 = vmul.f32 %v852_v19, %v2975_v2  ;;  %v774_v57 = vsel %vm3003_vm11, %v2645_v43, %v770_v24  ;;  %v775_v32 = vand.u32 2147483647, %v2598_v6  ;;  %1227 = vmatmul.f32.gmra.mxu2 %v1152_v48  ;;  %v777_v13 = vand.u32 2147483648, %v2598_v6  ;;  %v3374_v19 = vld [vmem:[#allocation62_spill] sm:$0xff] }
 0x17e   : > { %v1105_v38 = vsel %vm1073_vm4, %v1057_v20, %v1089_v60  ;;  %v946_v0 = vadd.f32 0.2548296, %v930_v62  ;;  %v899_v50 = vmul.f32 %v883_v29, %v2965_v49  ;;  %vm1074_vm12 = vcmp.ge.f32.partialorder %v3367_v51, 0.0  ;;  %v3377_v29 = vld [vmem:[#allocation58_spill] sm:$0xff] }
 0x17f   : > { %v1137_v16 = vadd.f32 1.0, %v1105_v38  ;;  %v884_v41 = vadd.f32 1.4214138, %v868_v5  ;;  %v3019_v53 = vsel %vm2990_vm9, %v763_v23, %v759_v56  ;;  %vm776_vm13 = vcmp.eq.f32.partialorder %v775_v32, 8.507059e+37  ;;  %v3392_v62 = vld [vmem:[#allocation38_spill] sm:$0xff] }
 0x180   : > { %vm801_vm14 = vweird.f32 %v2651_v10  ;;  %v962_v43 = vmul.f32 %v946_v0, %v2927_v54  ;;  %v915_v42 = vadd.f32 -0.28449672, %v899_v50  ;;  %v837_v59 = vmul.f32 1.0614054, %v3019_v53  ;;  %v3380_v0 = vld [vmem:[#allocation63_spill] sm:$0xff] }
 0x181   : > { %v778_v35 = vor.u32 1.1754944e-38, %v777_v13  ;;  %v1153_v26 = vmul.f32 %v1137_v16, %v3368_v40  ;;  %v900_v6 = vmul.f32 %v884_v41, %v2975_v2  ;;  %v785_v27 = vadd.f32 %v2678_v47, %v2729_v8 }
 0x182   : > { %vm787_vm15 = vweird.f32 %v2678_v47  ;;  %v1042_v33 = vmul.f32 %v3369_v7, %v962_v43  ;;  %v931_v58 = vmul.f32 %v915_v42, %v2965_v49  ;;  %v853_v39 = vadd.f32 -1.4531521, %v837_v59 }
 0x183   : > { %v3031_v1 = vsel %vm776_vm13, %v778_v35, %v774_v57  ;;  %vm3035_vm0 = vmor %vm786_vm8, %vm787_vm15  ;;  %1268 = vmatmul.f32.gmra.mxu3 %v1153_v26  ;;  %v916_v44 = vadd.f32 -0.28449672, %v900_v6  ;;  %v790_v45 = vand.u32 2147483647, %v2631_v34  ;;  %v792_v17 = vand.u32 2147483648, %v2631_v34 }
 0x184   : > { %v838_v63 = vmul.f32 1.0614054, %v3031_v1  ;;  %v789_v8 = vsel %vm3035_vm0, %v2678_v47, %v785_v27  ;;  %v1058_v22 = vsub.f32 1.0, %v1042_v33  ;;  %v947_v28 = vadd.f32 0.2548296, %v931_v58 }
 0x185   : > { %v869_v55 = vmul.f32 %v853_v39, %v3019_v53  ;;  %vm1075_vm1 = vcmp.ge.f32.partialorder %v3372_v52, 0.0  ;;  %v932_v9 = vmul.f32 %v916_v44, %v2975_v2  ;;  %vm791_vm2 = vcmp.eq.f32.partialorder %v790_v45, 8.507059e+37  ;;  %v3383_v44 = vld [vmem:[#allocation51_spill] sm:$0xff] }
 0x186   : > { %v854_v14 = vadd.f32 -1.4531521, %v838_v63  ;;  %v800_v37 = vadd.f32 %v2706_v30, %v2745_v21  ;;  %v1090_v18 = vsub.f32 0.0, %v1058_v22  ;;  %v963_v47 = vmul.f32 %v947_v28, %v2965_v49 }
 0x187   : > { %v885_v56 = vadd.f32 1.4214138, %v869_v55  ;;  %v793_v12 = vor.u32 1.1754944e-38, %v792_v17  ;;  %v948_v15 = vadd.f32 0.2548296, %v932_v9  ;;  %vm802_vm3 = vweird.f32 %v2706_v30  ;;  %v3384_v55 = vld [vmem:[#allocation65_spill] sm:$0xff] }
 0x188   : > { %v870_v20 = vmul.f32 %v854_v14, %v3031_v1  ;;  %v805_v34 = vand.u32 2147483647, %v2651_v10  ;;  %vm1076_vm4 = vcmp.ge.f32.partialorder %v3373_v61, 0.0  ;;  %v1106_v25 = vsel %vm1074_vm12, %v1058_v22, %v1090_v18  ;;  %vm3065_vm5 = vmor %vm801_vm14, %vm802_vm3  ;;  %v3387_v14 = vld [vmem:[#allocation64_spill] sm:$0xff]  ;;  %v3389_v61 = vld [vmem:[#allocation66_spill] sm:$0xff] }
 0x189   : > { %v1043_v4 = vmul.f32 %v3374_v19, %v963_v47  ;;  %v901_v21 = vmul.f32 %v885_v56, %v3019_v53  ;;  %v3059_v24 = vsel %vm791_vm2, %v793_v12, %v789_v8  ;;  %v1138_v49 = vadd.f32 1.0, %v1106_v25  ;;  %v3388_v56 = vld [vmem:[#allocation54_spill] sm:$0xff] }
 0x18a   : > { %v964_v31 = vmul.f32 %v948_v15, %v2975_v2  ;;  %v886_v48 = vadd.f32 1.4214138, %v870_v20  ;;  %v839_v60 = vmul.f32 1.0614054, %v3059_v24  ;;  %v3378_v11 = vsub.f32 0.0, %v3377_v29  ;;  %v3379_v2 = vld [vmem:[#allocation41_spill] sm:$0xff] }
 0x18b   : > { %v1059_v23 = vsub.f32 1.0, %v1043_v4  ;;  %v917_v57 = vadd.f32 -0.28449672, %v901_v21  ;;  %v804_v32 = vsel %vm3065_vm5, %v2706_v30, %v800_v37  ;;  %v1154_v38 = vmul.f32 %v1138_v49, %v3379_v2 }
 0x18c   : > { %v1000_v5 = vmul.f32 %v3378_v11, %v3377_v29  ;;  %v1044_v50 = vmul.f32 %v3380_v0, %v964_v31  ;;  %v902_v13 = vmul.f32 %v886_v48, %v3031_v1  ;;  %v855_v51 = vadd.f32 -1.4531521, %v839_v60  ;;  %v3391_v31 = vld [vmem:[#allocation42_spill] sm:$0xff] }
 0x18d   : > { %v1091_v16 = vsub.f32 0.0, %v1059_v23  ;;  %v933_v41 = vmul.f32 %v917_v57, %v3019_v53  ;;  %vm3079_vm6 = vcmp.eq.f32.partialorder %v805_v34, 8.507059e+37  ;;  %v807_v42 = vand.u32 2147483648, %v2651_v10  ;;  %1230 = vmatmul.f32.gmra.mxu2 %v1154_v38 }
 0x18e   : > { %v1060_v59 = vsub.f32 1.0, %v1044_v50  ;;  %v918_v35 = vadd.f32 -0.28449672, %v902_v13  ;;  %v871_v30 = vmul.f32 %v855_v51, %v3059_v24  ;;  %v815_v40 = vadd.f32 %v2738_v3, %v2769_v36  ;;  %v3393_v13 = vld [vmem:[#allocation47_spill] sm:$0xff] }
 0x18f   : > { %v1107_v26 = vsel %vm1075_vm1, %v1059_v23, %v1091_v16  ;;  %v949_v6 = vadd.f32 0.2548296, %v933_v41  ;;  %v808_v27 = vor.u32 1.1754944e-38, %v807_v42  ;;  %vm817_vm7 = vweird.f32 %v2738_v3 }
 0x190   : > { %v1139_v7 = vadd.f32 1.0, %v1107_v26  ;;  %v1092_v33 = vsub.f32 0.0, %v1060_v59  ;;  %v934_v58 = vmul.f32 %v918_v35, %v3031_v1  ;;  %v887_v10 = vadd.f32 1.4214138, %v871_v30  ;;  %v3394_v35 = vld [vmem:[#allocation44_spill] sm:$0xff] }
 0x191   : > { %vm816_vm8 = vweird.f32 %v2674_v46  ;;  %v965_v39 = vmul.f32 %v949_v6, %v3019_v53  ;;  %v3095_v54 = vsel %vm3079_vm6, %v808_v27, %v804_v32  ;;  %v820_v36 = vand.u32 2147483647, %v2674_v46 }
 0x192   : > { %v1155_v63 = vmul.f32 %v1139_v7, %v3383_v44  ;;  %v1108_v8 = vsel %vm1076_vm4, %v1060_v59, %v1092_v33  ;;  %v950_v45 = vadd.f32 0.2548296, %v934_v58  ;;  %v903_v22 = vmul.f32 %v887_v10, %v3059_v24  ;;  %vm3106_vm9 = vmor %vm816_vm8, %vm817_vm7  ;;  %v3395_v10 = vld [vmem:[#allocation52_spill] sm:$0xff] }
 0x193   : > { %v1140_v28 = vadd.f32 1.0, %v1108_v8  ;;  %v1045_v17 = vmul.f32 %v3384_v55, %v965_v39  ;;  %v840_v52 = vmul.f32 1.0614054, %v3095_v54  ;;  %v822_v9 = vand.u32 2147483648, %v2674_v46  ;;  %v3390_v46 = vld [vmem:[#allocation61_spill] sm:$0xff] }
 0x194   : > { %1713 = vpow2.f32 %v3387_v14  ;;  %1271 = vmatmul.f32.gmra.mxu3 %v1155_v63  ;;  %v966_v37 = vmul.f32 %v950_v45, %v3031_v1  ;;  %v919_v18 = vadd.f32 -0.28449672, %v903_v22  ;;  %v819_v47 = vsel %vm3106_vm9, %v2738_v3, %v815_v40  ;;  %v3396_v63 = vld [vmem:[#allocation49_spill] sm:$0xff] }
 0x195   : > { %v1156_v12 = vmul.f32 %v1140_v28, %v3388_v56  ;;  %v1061_v15 = vsub.f32 1.0, %v1045_v17  ;;  %v856_v20 = vadd.f32 -1.4531521, %v840_v52  ;;  %v823_v34 = vor.u32 1.1754944e-38, %v822_v9 }
 0x196   : > { %v1046_v25 = vmul.f32 %v3389_v61, %v966_v37  ;;  %v935_v19 = vmul.f32 %v919_v18, %v3059_v24  ;;  %vm821_vm10 = vcmp.eq.f32.partialorder %v820_v36, 8.507059e+37  ;;  %v985_v4 = vsub.f32 0.0, %v3390_v46 }
 0x197   : > { %1233 = vmatmul.f32.gmra.mxu2 %v1156_v12  ;;  %v1093_v21 = vsub.f32 0.0, %v1061_v15  ;;  %v872_v1 = vmul.f32 %v856_v20, %v3095_v54  ;;  %v824_v49 = vsel %vm821_vm10, %v823_v34, %v819_v47  ;;  %vm1077_vm11 = vcmp.ge.f32.partialorder %v3391_v31, 0.0  ;;  %v3397_v47 = vld [vmem:[#allocation56_spill] sm:$0xff] }
 0x198   : > { %v1062_v3 = vsub.f32 1.0, %v1046_v25  ;;  %v951_v48 = vadd.f32 0.2548296, %v935_v19  ;;  %v841_v60 = vmul.f32 1.0614054, %v824_v49  ;;  %v1125_v29 = vmul.f32 0.5, %v3392_v62 }
 0x199   : > { %v1030_v11 = vmul.f32 1.442695, %v1000_v5  ;;  %v1109_v23 = vsel %vm1077_vm11, %v1061_v15, %v1093_v21  ;;  %v888_v57 = vadd.f32 1.4214138, %v872_v1  ;;  %vm1078_vm12 = vcmp.ge.f32.partialorder %v3393_v13, 0.0  ;;  %v3398_v15 = vld [vmem:[#allocation53_spill] sm:$0xff] }
 0x19a   : > { %v1714_v32 = vpop.eup %1713  ;;  %v1141_v2 = vadd.f32 1.0, %v1109_v23  ;;  %v1094_v38 = vsub.f32 0.0, %v1062_v3  ;;  %v967_v0 = vmul.f32 %v951_v48, %v3059_v24  ;;  %v857_v50 = vadd.f32 -1.4531521, %v841_v60  ;;  %v3399_v19 = vld [vmem:[#allocation59_spill] sm:$0xff] }
 0x19b   : > { %v1001_v51 = vmul.f32 %v985_v4, %v3390_v46  ;;  %v904_v16 = vmul.f32 %v888_v57, %v3095_v54  ;;  %v1126_v5 = vmul.f32 0.5, %v3394_v35  ;;  %1715 = vpow2.f32 %v1030_v11  ;;  %v3400_v4 = vld [vmem:[#allocation55_spill] sm:$0xff]  ;;  %v1198_v35 = vld [vmem:[#allocation2 + $0x8] sm:$0xff] }
 0x19c   : > { %v1157_v41 = vmul.f32 %v1141_v2, %v1125_v29  ;;  %v1110_v43 = vsel %vm1078_vm12, %v1062_v3, %v1094_v38  ;;  %v1047_v42 = vmul.f32 %v1714_v32, %v967_v0  ;;  %v873_v59 = vmul.f32 %v857_v50, %v824_v49  ;;  %v1194_v3 = vld [vmem:[#allocation2 + $0x30] sm:$0xff]  ;;  %v1195_v11 = vld [vmem:[#allocation2] sm:$0xff]  ;;  %v1196_v38 = vld [vmem:[#allocation2 + $0x18] sm:$0xff] }
 0x19d   : > { %v1142_v30 = vadd.f32 1.0, %v1110_v43  ;;  %v920_v40 = vadd.f32 -0.28449672, %v904_v16  ;;  %v1032_v24 = vmul.f32 1.442695, %v1001_v51  ;;  %vm1079_vm13 = vcmp.ge.f32.partialorder %v3395_v10, 0.0 }
 0x19e   : > { %1274 = vmatmul.f32.gmra.mxu3 %v1157_v41  ;;  %v1063_v26 = vsub.f32 1.0, %v1047_v42  ;;  %v889_v6 = vadd.f32 1.4214138, %v873_v59  ;;  %v1127_v8 = vmul.f32 0.5, %v3396_v63  ;;  %vm1080_vm14 = vcmp.ge.f32.partialorder %v3397_v47, 0.0  ;;  %v1197_v16 = vld [vmem:[#allocation2 + $0x10] sm:$0xff] }
 0x19f   : > { %v1158_v27 = vmul.f32 %v1142_v30, %v1126_v5  ;;  %v936_v7 = vmul.f32 %v920_v40, %v3095_v54  ;;  %1717 = vpow2.f32 %v1032_v24  ;;  %v1128_v20 = vmul.f32 0.5, %v3398_v15  ;;  %v1201_v63 = vld [vmem:[#allocation2 + $0x38] sm:$0xff] }
 0x1a0   : > { %v1095_v33 = vsub.f32 0.0, %v1063_v26  ;;  %v905_v58 = vmul.f32 %v889_v6, %v824_v49  ;;  %vm1081_vm15 = vcmp.ge.f32.partialorder %v3399_v19, 0.0  ;;  %v1129_v21 = vmul.f32 0.5, %v3400_v4  ;;  %v1199_v6 = vld [vmem:[#allocation2 + $0x20] sm:$0xff] }
 0x1a1   : > { %1236 = vmatmul.f32.gmra.mxu2 %v1158_v27  ;;  %v952_v39 = vadd.f32 0.2548296, %v936_v7  ;;  %v1716_v28 = vpop.eup %1715 }
 0x1a2   : > { %v1111_v36 = vsel %vm1079_vm13, %v1063_v26, %v1095_v33  ;;  %v921_v44 = vadd.f32 -0.28449672, %v905_v58  ;;  %v1200_v58 = vld [vmem:[#allocation2 + $0x28] sm:$0xff] }
 0x1a3   : > { %v1143_v45 = vadd.f32 1.0, %v1111_v36  ;;  %v968_v22 = vmul.f32 %v952_v39, %v3095_v54 }
 0x1a4   : > { %v937_v55 = vmul.f32 %v921_v44, %v824_v49 }
 0x1a5   : > { %v1159_v17 = vmul.f32 %v1143_v45, %v1127_v8  ;;  %v1048_v52 = vmul.f32 %v1716_v28, %v968_v22  ;;  %v1718_v37 = vpop.eup %1717 }
 0x1a6   : > { %v953_v53 = vadd.f32 0.2548296, %v937_v55 }
 0x1a7   : > { %1277 = vmatmul.f32.gmra.mxu3 %v1159_v17  ;;  %v1064_v9 = vsub.f32 1.0, %v1048_v52 }
 0x1a8   : > { %v969_v14 = vmul.f32 %v953_v53, %v824_v49 }
 0x1a9   : > { %v1096_v18 = vsub.f32 0.0, %v1064_v9 }
 0x1aa   : > { %v1049_v56 = vmul.f32 %v1718_v37, %v969_v14 }
 0x1ab   : > { %v1112_v12 = vsel %vm1080_vm14, %v1064_v9, %v1096_v18 }
 0x1ac   : > { %v1144_v34 = vadd.f32 1.0, %v1112_v12  ;;  %v1065_v61 = vsub.f32 1.0, %v1049_v56 }
 0x1ae   : > { %v1160_v25 = vmul.f32 %v1144_v34, %v1128_v20  ;;  %v1097_v54 = vsub.f32 0.0, %v1065_v61 }
 0x1b0   : > { %1239 = vmatmul.f32.gmra.mxu2 %v1160_v25  ;;  %v1113_v46 = vsel %vm1081_vm15, %v1065_v61, %v1097_v54 }
 0x1b1   : > { %v1145_v1 = vadd.f32 1.0, %v1113_v46 }
 0x1b3   : > { %v1161_v49 = vmul.f32 %v1145_v1, %v1129_v21 }
 0x1b5   : > { %1280 = vmatmul.f32.gmra.mxu3 %v1161_v49 }
 0x1da   : > { %v1219_v31 = vpop.f32.mrf.mxu2 }
 0x1e8   : > { %v1260_v48 = vpop.f32.mrf.mxu3 }
 0x1e9   : > { %v1261_v60 = vadd.f32 %v1260_v48, %v1219_v31 }
 0x1eb   : > { %v1284_v62 = vadd.f32 %v1261_v60, %v1194_v3 }
 0x1ed   : > { %1292 = vst [vmem:[#allocation2 + $0x30] sm:$0xff] %v1284_v62  ;;  %v1222_v29 = vpop.f32.mrf.mxu2 }
 0x1f1   : > { %v1263_v23 = vpop.f32.mrf.mxu3 }
 0x1f2   : > { %v1264_v57 = vadd.f32 %v1263_v23, %v1222_v29 }
 0x1f4   : > { %v1285_v32 = vadd.f32 %v1264_v57, %v1195_v11 }
 0x1f5   : > { %v1225_v2 = vpop.f32.mrf.mxu2 }
 0x1f6   : > { %1293 = vst [vmem:[#allocation2] sm:$0xff] %v1285_v32 }
 0x1f9   : > { %v1266_v0 = vpop.f32.mrf.mxu3 }
 0x1fa   : > { %v1267_v50 = vadd.f32 %v1266_v0, %v1225_v2 }
 0x1fc   : > { %v1286_v13 = vadd.f32 %v1267_v50, %v1196_v38 }
 0x1fe   : > { %1294 = vst [vmem:[#allocation2 + $0x18] sm:$0xff] %v1286_v13 }
 0x200   : > { %v1228_v51 = vpop.f32.mrf.mxu2 }
 0x206   : > { %v1269_v41 = vpop.f32.mrf.mxu3 }
 0x207   : > { %v1270_v43 = vadd.f32 %v1269_v41, %v1228_v51 }
 0x209   : > { %v1287_v42 = vadd.f32 %v1270_v43, %v1197_v16 }
 0x20b   : > { %1295 = vst [vmem:[#allocation2 + $0x10] sm:$0xff] %v1287_v42 }
 0x210   : > { %v1231_v59 = vpop.f32.mrf.mxu2 }
 0x217   : > { %v1272_v5 = vpop.f32.mrf.mxu3 }
 0x218   : > { %v1273_v30 = vadd.f32 %v1272_v5, %v1231_v59 }
 0x21a   : > { %v1288_v40 = vadd.f32 %v1273_v30, %v1198_v35  ;;  %v1234_v26 = vpop.f32.mrf.mxu2 }
 0x21c   : > { %1296 = vst [vmem:[#allocation2 + $0x8] sm:$0xff] %v1288_v40 }
 0x221   : > { %v1275_v24 = vpop.f32.mrf.mxu3 }
 0x222   : > { %v1276_v27 = vadd.f32 %v1275_v24, %v1234_v26 }
 0x224   : > { %v1289_v7 = vadd.f32 %v1276_v27, %v1199_v6  ;;  %v1237_v33 = vpop.f32.mrf.mxu2 }
 0x226   : > { %1297 = vst [vmem:[#allocation2 + $0x20] sm:$0xff] %v1289_v7 }
 0x22a   : > { %v1278_v10 = vpop.f32.mrf.mxu3 }
 0x22b   : > { %v1279_v39 = vadd.f32 %v1278_v10, %v1237_v33 }
 0x22d   : > { %v1290_v36 = vadd.f32 %v1279_v39, %v1200_v58 }
 0x22f   : > { %1298 = vst [vmem:[#allocation2 + $0x28] sm:$0xff] %v1290_v36 }
 0x233   : > { %v1240_v44 = vpop.f32.mrf.mxu2 }
 0x238   : > { %v1281_v8 = vpop.f32.mrf.mxu3 }
 0x239   : > { %v1282_v45 = vadd.f32 %v1281_v8, %v1240_v44  ;;  %1303 = sbr.rel (%p1520_p8) target bundleno = 585 (0x249), region = 64 }
 0x23b   : > { %v1291_v22 = vadd.f32 %v1282_v45, %v1201_v63 }
 0x23d   : > { %1299 = vst [vmem:[#allocation2 + $0x38] sm:$0xff] %v1291_v22 }
 0x23e   : > { %v1304_v28 = vld [vmem:[#allocation2 + $0x30] sm:$0xff]  ;;  %v1719_v55 = vld [vmem:[%s3401_s20] ss:$0 sm:$0xff]  ;;  %v1306_v52 = vld [vmem:[#allocation2 + $0x18] sm:$0xff] }
 0x23f   : > { %v1305_v17 = vld [vmem:[#allocation2] sm:$0xff]  ;;  %v1307_v53 = vld [vmem:[#allocation2 + $0x10] sm:$0xff]  ;;  %v1316_v9 = vadd.f32 %v1719_v55, %v1304_v28  ;;  %v1318_v37 = vadd.f32 %v1719_v55, %v1306_v52  ;;  %v1308_v18 = vld [vmem:[#allocation2 + $0x8] sm:$0xff] }
 0x240   : > { %v1317_v14 = vadd.f32 %v1719_v55, %v1305_v17  ;;  %v1309_v47 = vld [vmem:[#allocation2 + $0x20] sm:$0xff]  ;;  %v1319_v56 = vadd.f32 %v1719_v55, %v1307_v53  ;;  %v1310_v12 = vld [vmem:[#allocation2 + $0x28] sm:$0xff]  ;;  %v1320_v15 = vadd.f32 %v1719_v55, %v1308_v18 }
 0x241   : > { %1324 = vst [vmem:[%s2224_s30] sm:$0xff] %v1316_v9  ;;  %v1321_v34 = vadd.f32 %v1719_v55, %v1309_v47  ;;  %v1322_v61 = vadd.f32 %v1719_v55, %v1310_v12 }
 0x242   : > { %1325 = vst [vmem:[%s2224_s30 + $0x8] sm:$0xff] %v1317_v14 }
 0x243   : > { %1326 = vst [vmem:[%s2224_s30 + $0x10] sm:$0xff] %v1318_v37 }
 0x244   : > { %v1311_v20 = vld [vmem:[#allocation2 + $0x38] sm:$0xff]  ;;  %1327 = vst [vmem:[%s2224_s30 + $0x18] sm:$0xff] %v1319_v56 }
 0x245   : > { %v1323_v25 = vadd.f32 %v1719_v55, %v1311_v20  ;;  %1328 = vst [vmem:[%s2224_s30 + $0x20] sm:$0xff] %v1320_v15 }
 0x246   : > { %1329 = vst [vmem:[%s2224_s30 + $0x28] sm:$0xff] %v1321_v34 }
 0x247   : > { %1330 = vst [vmem:[%s2224_s30 + $0x30] sm:$0xff] %v1322_v61 }
 0x248   : > { %1331 = vst [vmem:[%s2224_s30 + $0x38] sm:$0xff] %v1323_v25 }
 0x249 PF: > { %s3402_s24 = sld [smem:[#allocation19_spill]]  ;;  %s1345_s12 = sshll.u32 %s2224_s30, 4  ;;  %s1346_s12 = int_to_ptr.vmem [resolvable:$true] %s1345_s12 }
 0x24a   : > { %s3404_s17 = sld [smem:[#allocation70_spill]]  ;;  %s1333_s23 = scalar_lea.sflag [#allocation5], %s2198_s0 }
 0x24f   : > { %s1529_s11 = sshll.u32 %s3402_s24, 6 }
 0x250   : > { %s1344_s18 = scalar_lea.hbm %s3404_s17, %s1529_s11  ;;  %s1860_s25 = scalar_lea.hbm %s3404_s17, 128 }
 0x251   : > { %s1347_s7 = sshll.u32 %s1344_s18, 4  ;;  %s1348_s7 = int_to_ptr.hbm [resolvable:$true] %s1347_s7 }
 0x252   : > { %s1854_s28 = sshra.s32 %s1348_s7, 4  ;;  %s1855_s28 = int_to_ptr.hbm [resolvable:$true] %s1854_s28 }
 0x253   : > { %s1856_s16 = scalar_lea.hbm %s1855_s28, 64  ;;  %p1861_p4 = scmp.lt.s32.totalorder %s1855_s28, %s3404_s17 }
 0x254   : > { %p1857_p11 = scmp.ne.s32.totalorder %s1855_s28, %s1856_s16  ;;  %p1862_p6 = scmp.lt.s32.totalorder %s1860_s25, %s1856_s16 }
 0x256   : > { %p1858_p12 = pnand %p1857_p11, %p2159_p1  ;;  %p1863_p0 = por %p1862_p6, %p1861_p4 }
 0x258   : > { %p1859_p13 = pneg %p1858_p12 }
 0x25a   : > { %p1864_p7 = pnand %p1863_p0, %p1859_p13 }
 0x25c   : > { %1867 = shalt.err (!%p1864_p7)
}
 0x25d   : > { %s1978_s0 = smov 128   ;;  %s1979_s15 = smov 8  }
 0x25e   : > { %1538 = dma.vmem_to_hbm [thread:$0]  (%p2159_p1), %s1346_s12, 1024, %s1348_s7, %s1333_s23, %s1978_s0, %s1978_s0, %s1979_s15  }
 0x25f PF: > { %s3405_s10 = sld [smem:[#allocation21_spill]] }
 0x260   : > { %s3406_s8 = sld [smem:[#allocation17_spill]] }
 0x265   : > { %p1558_p9 = scmp.ge.s32.totalorder %s3405_s10, 2 }
 0x266   : > { %s1362_s30 = sand.u32 1, %s3406_s8  }
 0x267   : > { %p1554_p10 = pnand %p1558_p9, %p2166_p2  ;;  %s1363_s5 = scalar_lea.sflag [#allocation5], %s1362_s30 }
 0x269   : > { %p1555_p3 = pneg %p1554_p10 }
 0x26b   : > { %1925 = dma.done.wait (%p1555_p3), %s1363_s5, 1024  }
 0x26c   : > { %1927 = vsyncadd (%p1555_p3), %s1363_s5, 4294966272  ;;  %s27_s28 = sadd.s32 1, %s3405_s10   ;;  %s3408_s29 = sld [smem:[#allocation16_spill]] }
 0x26d   : > { %p24_p5 = scmp.ge.s32.totalorder %s27_s28, 6   ;;  %s3409_s20 = sld [smem:[#allocation24_spill]] }
 0x26e   : > { %s3410_s24 = sld [smem:[#allocation18_spill]]  ;;  %s3415_s18 = smov %s1934_s19 }
 0x26f   : > { %s3411_s23 = sld [smem:[#allocation25_spill]]  ;;  %s3417_s21 = smov %s1946_s22 }
 0x270   : > { %s3412_s25 = sld [smem:[#allocation20_spill]] }
 0x271   : > { %s3413_s1 = sld [smem:[#allocation22_spill]] }
 0x272   : > { %s3414_s27 = sld [smem:[#allocation23_spill]]  ;;  %s3416_s19 = smov %s3408_s29 }
 0x273   :  { %26 = sbr.rel (!%p24_p5) target bundleno = 18 (0x12), region = 130 }
 0x274   : > { %s3418_s22 = smov %s3410_s24  ;;  %s3419_s24 = smov %s1962_s26 }
 0x277   : > { %s3420_s26 = smov %s3413_s1 }
 0x278   :  { %1369 = vsyncpa [#allocation4], 1 }
 0x279   :  { %1371 = vsyncpa [#allocation4 + $0x1], 1 }
 0x27a   :  { %1372 = vsyncpa [#allocation7], 1 }
 0x27b   :  { %1374 = vsyncpa [#allocation7 + $0x1], 1 }
 0x27c   :  { %1375 = vsyncpa [#allocation10], 1 }
 0x27d   :  { %1377 = vsyncpa [#allocation10 + $0x1], 1 }
 0x27e   :  { %1378 = vsyncpa [#allocation5], 1 }
 0x27f   :  { %1380 = vsyncpa [#allocation5 + $0x1], 1 }

</bundles_post_ra>
